<compile_context>
chip_gen: v7x
topology: tpu7x:2x2x1
jax: 0.10.0
libtpu: 0.0.40
codegen_flags: <defaults>
</compile_context>

<pallas_src>
from functools import partial

import jax
import jax.numpy as jnp
from jax.experimental import pallas as pl
from jax.experimental.pallas import tpu as pltpu


# ----------------------------------------------------------------------------
# Fused kernel: hoisted biLSTM input projection + fused fwd/bwd recurrence +
# two GAT-style label-attention layers + final projection.
# ----------------------------------------------------------------------------
def _magnet_kernel(x_ref, wih_all_ref, b_all_ref, whh_f_ref, whh_b_ref,
                   label_ref, w1t_ref, w2t_ref, we_ref, adj_ref,
                   out_ref, *, seq_len, batch, hidden, slope):
    T, B, H = seq_len, batch, hidden
    H2, H4 = 2 * H, 4 * H

    # ---- 1. Hoisted input projection: one MXU matmul covering all timesteps
    #         and BOTH directions; (b_ih + b_hh) folded in once.
    xp = (jnp.dot(x_ref[...], wih_all_ref[...],
                  preferred_element_type=jnp.float32)
          + b_all_ref[...])                                    # (T*B, 8H)

    whh_f = whh_f_ref[...]                                     # (H, 4H)
    whh_b = whh_b_ref[...]                                     # (H, 4H)

    def lstm_cell(pre, h, c, whh):
        # PyTorch gate order: i, f, g, o.
        gates = pre + jnp.dot(h, whh, preferred_element_type=jnp.float32)
        sg = jax.nn.sigmoid(gates)       # one EUP pass over the full 4H span
        i = sg[:, 0 * H:1 * H]
        f = sg[:, 1 * H:2 * H]
        o = sg[:, 3 * H:4 * H]
        g = jnp.tanh(gates[:, 2 * H:3 * H])
        c_new = f * c + i * g
        h_new = o * jnp.tanh(c_new)
        return h_new, c_new

    # ---- 2. Fused fwd/bwd recurrence, fully unrolled (T is small & static),
    #         all slice offsets static and sublane-aligned (B multiple of 8).
    # TODO(synk): for long sequences switch to a rolled fori_loop over a
    # double-buffered pre-activation scratch instead of full unrolling.
    zeros = jnp.zeros((B, H), jnp.float32)
    h_f, c_f, h_b, c_b = zeros, zeros, zeros, zeros
    for t in range(T):
        rt = T - 1 - t
        pre_f = xp[t * B:(t + 1) * B, 0:H4]                    # fwd, time t
        pre_b = xp[rt * B:(rt + 1) * B, H4:2 * H4]             # bwd, time T-1-t
        h_f, c_f = lstm_cell(pre_f, h_f, c_f, whh_f)
        h_b, c_b = lstm_cell(pre_b, h_b, c_b, whh_b)

    # embedding = torch.cat([h[-2], h[-1]], dim=1) of the 1-layer biLSTM.
    emb = jnp.concatenate([h_f, h_b], axis=1)                  # (B, 2H)

    # ---- 3. Two GAT-style label-attention layers + final projection.
    # All `heads` heads compute identical values in the reference forward, so
    # the mean over heads is the identity and is elided.  Dropout is the
    # eval-mode identity.
    adj = adj_ref[...]                                         # (n, n)
    we = we_ref[...]                                           # (1, 4H)
    w_src = we[:, 0:H2]                                        # (1, 2H)
    w_dst = we[:, H2:2 * H2]                                   # (1, 2H)

    def leaky(x):
        return jnp.where(x >= 0, x, slope * x)

    def gat_layer(L, Wt):
        LE = jnp.dot(L, Wt, preferred_element_type=jnp.float32)        # (n, 2H)
        # column scores (n, 1): lane reduction; row scores (1, n): A @ B^T
        # style dot_general (no explicit transpose anywhere).
        s_src = jnp.sum(LE * w_src, axis=1, keepdims=True)             # (n, 1)
        s_dst = jax.lax.dot_general(
            w_dst, LE, dimension_numbers=(((1,), (1,)), ((), ())),
            preferred_element_type=jnp.float32)                        # (1, n)
        e = leaky(s_src + s_dst)                                       # (n, n)
        att = jnp.tanh(e * adj)                                        # (n, n)
        new_h = jnp.dot(att, LE, preferred_element_type=jnp.float32)   # (n, 2H)
        return leaky(new_h)

    L = gat_layer(label_ref[...], w1t_ref[...])   # transform_dim1
    L = gat_layer(L, w2t_ref[...])                # transform_dim2

    # predicted_labels = embedding @ label_embedding.T  (A @ B^T dot_general)
    out_ref[...] = jax.lax.dot_general(
        emb, L, dimension_numbers=(((1,), (1,)), ((), ())),
        preferred_element_type=jnp.float32)


# ----------------------------------------------------------------------------
# Wrapper
# ----------------------------------------------------------------------------
def magnet_forward(params, token, label_embedding):
    B, T = token.shape
    H = params["hidden_size"]

    # Pad batch to a sublane multiple so every per-timestep slice inside the
    # kernel is sublane-aligned; free on MXU/VPU (they pad to 8 rows anyway).
    Bp = max(8, ((B + 7) // 8) * 8)
    if Bp != B:
        token = jnp.pad(token, ((0, Bp - B), (0, 0)))

    # Embedding lookup (plain-JAX glue).  Time-major (T*Bp, D) rows so the
    # kernel's hoisted projection is a single contiguous 2-D matmul.
    feats = jnp.take(params["embeddings"], token, axis=0)             # (Bp, T, D)
    D = feats.shape[-1]
    x2d = jnp.transpose(feats, (1, 0, 2)).reshape(T * Bp, D).astype(jnp.float32)

    n = label_embedding.shape[0]
    vmem = pl.BlockSpec(memory_space=pltpu.MemorySpace.VMEM)

    kernel = partial(_magnet_kernel, seq_len=T, batch=Bp, hidden=H,
                     slope=params["slope"])

    pred = pl.pallas_call(
        kernel,
        out_shape=jax.ShapeDtypeStruct((Bp, n), jnp.float32),
        in_specs=[vmem] * 10,
        out_specs=vmem,
        compiler_params=pltpu.CompilerParams(
            vmem_limit_bytes=32 * 1024 * 1024),
    )(x2d,
      params["wih_all"], params["b_all"],
      params["whh_f_t"], params["whh_b_t"],
      label_embedding.astype(jnp.float32),
      params["w1_t"], params["w2_t"], params["we"], params["adjacency"])
    return pred[:B]


def init_params(key, vocab, D, H, n_labels, heads, slope):
    ks = jax.random.split(key, 14)

    def rnd(k, shape, scale=0.1):
        return (scale * jax.random.normal(k, shape)).astype(jnp.float32)

    # Embedding table (nn.Embedding.from_pretrained(embeddings))
    embeddings = rnd(ks[0], (vocab, D))

    # LSTM: PyTorch weight_ih (4H, D), weight_hh (4H, H), biases (4H,)
    wih_f = rnd(ks[1], (4 * H, D))
    whh_f = rnd(ks[2], (4 * H, H))
    b_f = rnd(ks[3], (4 * H,)) + rnd(ks[4], (4 * H,))      # b_ih + b_hh
    wih_b = rnd(ks[5], (4 * H, D))
    whh_b = rnd(ks[6], (4 * H, H))
    b_b = rnd(ks[7], (4 * H,)) + rnd(ks[8], (4 * H,))

    # transform_dim1: Linear(D, 2H, bias=False); transform_dim2: Linear(2H, 2H)
    w1 = rnd(ks[9], (2 * H, D))
    w2 = rnd(ks[10], (2 * H, 2 * H))
    # edge_weights: Linear(4H, 1, bias=False) -> weight (1, 4H)
    we = rnd(ks[11], (1, 4 * H))
    # adjacency parameter (n, n)
    adjacency = jax.random.uniform(ks[12], (n_labels, n_labels),
                                   dtype=jnp.float32)

    # Combined input-projection weight for both directions (D, 8H) and folded
    # biases (1, 8H) so the kernel does a single hoisted matmul.
    wih_all = jnp.concatenate([wih_f.T, wih_b.T], axis=1).astype(jnp.float32)
    b_all = jnp.concatenate([b_f, b_b]).reshape(1, 8 * H).astype(jnp.float32)

    return {
        "embeddings": embeddings,
        "wih_all": wih_all, "b_all": b_all,
        "whh_f_t": whh_f.T, "whh_b_t": whh_b.T,
        "w1_t": w1.T, "w2_t": w2.T, "we": we,
        "adjacency": adjacency,
        "hidden_size": H, "heads": heads, "slope": slope,
    }, ks[13]


if __name__ == "__main__":
    # Small, forward-consistent shapes.
    B, T = 2, 8
    VOCAB = 50
    D = 32            # input_size (embedding dim)
    H = 32            # hidden_size  -> biLSTM embedding dim = 2H = 64
    N_LABELS = 8
    HEADS = 4
    SLOPE = 0.01

    key = jax.random.PRNGKey(0)
    params, key = init_params(key, VOCAB, D, H, N_LABELS, HEADS, SLOPE)

    k_tok, k_lab = jax.random.split(key)
    token = jax.random.randint(k_tok, (B, T), 0, VOCAB, dtype=jnp.int32)
    label_embedding = (0.1 * jax.random.normal(k_lab, (N_LABELS, D))
                       ).astype(jnp.float32)

    # TODO(synk): dropout is the eval-mode identity; training-mode masking is
    # not implemented (self.softmax is unused in the reference forward).
    out = magnet_forward(params, token, label_embedding)
    out = jax.block_until_ready(out)
    assert out.shape == (B, N_LABELS) and out.dtype == jnp.float32
    print("KERNEL_OK")
</pallas_src>

<mosaic_0001>
module attributes {stable_mosaic.version = 11 : i64} {
  func.func @_magnet_kernel(%arg0: memref<64x32xf32, #tpu.memory_space<vmem>>, %arg1: memref<32x256xf32, #tpu.memory_space<vmem>>, %arg2: memref<1x256xf32, #tpu.memory_space<vmem>>, %arg3: memref<32x128xf32, #tpu.memory_space<vmem>>, %arg4: memref<32x128xf32, #tpu.memory_space<vmem>>, %arg5: memref<8x32xf32, #tpu.memory_space<vmem>>, %arg6: memref<32x64xf32, #tpu.memory_space<vmem>>, %arg7: memref<64x64xf32, #tpu.memory_space<vmem>>, %arg8: memref<1x128xf32, #tpu.memory_space<vmem>>, %arg9: memref<8x8xf32, #tpu.memory_space<vmem>>, %arg10: memref<8x8xf32, #tpu.memory_space<vmem>>) attributes {dimension_semantics = [], scalar_prefetch = 0 : i64, scratch_operands = 0 : i64, tpu.core_type = #tpu.core_type<tc>} {
    %c0 = arith.constant 0 : index
    %c0_0 = arith.constant 0 : index
    %0 = vector.load %arg0[%c0, %c0_0] : memref<64x32xf32, #tpu.memory_space<vmem>>, vector<64x32xf32>
    %c0_1 = arith.constant 0 : index
    %c0_2 = arith.constant 0 : index
    %1 = vector.load %arg1[%c0_1, %c0_2] : memref<32x256xf32, #tpu.memory_space<vmem>>, vector<32x256xf32>
    %cst = arith.constant dense<0.000000e+00> : vector<64x256xf32>
    %2 = tpu.matmul %0, %1, %cst {dimension_numbers = #tpu.dot_dimension_numbers<[1], [0], [0], [1], [0, 0, 1, 1], [], []>} : vector<64x32xf32>, vector<32x256xf32>, vector<64x256xf32> -> vector<64x256xf32>
    %c0_3 = arith.constant 0 : index
    %c0_4 = arith.constant 0 : index
    %3 = vector.load %arg2[%c0_3, %c0_4] : memref<1x256xf32, #tpu.memory_space<vmem>>, vector<1x256xf32>
    %4 = vector.broadcast %3 : vector<1x256xf32> to vector<64x256xf32>
    %5 = arith.addf %2, %4 : vector<64x256xf32>
    %c0_5 = arith.constant 0 : index
    %c0_6 = arith.constant 0 : index
    %6 = vector.load %arg3[%c0_5, %c0_6] : memref<32x128xf32, #tpu.memory_space<vmem>>, vector<32x128xf32>
    %c0_7 = arith.constant 0 : index
    %c0_8 = arith.constant 0 : index
    %7 = vector.load %arg4[%c0_7, %c0_8] : memref<32x128xf32, #tpu.memory_space<vmem>>, vector<32x128xf32>
    %cst_9 = arith.constant 0.000000e+00 : f32
    %8 = vector.broadcast %cst_9 : f32 to vector<8x32xf32>
    %9 = vector.extract_strided_slice %5 {offsets = [0, 0], sizes = [8, 128], strides = [1, 1]} : vector<64x256xf32> to vector<8x128xf32>
    %10 = vector.extract_strided_slice %5 {offsets = [56, 128], sizes = [8, 128], strides = [1, 1]} : vector<64x256xf32> to vector<8x128xf32>
    %cst_10 = arith.constant dense<0.000000e+00> : vector<8x128xf32>
    %11 = tpu.matmul %8, %6, %cst_10 {dimension_numbers = #tpu.dot_dimension_numbers<[1], [0], [0], [1], [0, 0, 1, 1], [], []>} : vector<8x32xf32>, vector<32x128xf32>, vector<8x128xf32> -> vector<8x128xf32>
    %12 = arith.addf %9, %11 : vector<8x128xf32>
    %13 = arith.negf %12 : vector<8x128xf32>
    %14 = math.exp %13 : vector<8x128xf32>
    %cst_11 = arith.constant 1.000000e+00 : f32
    %15 = vector.broadcast %cst_11 : f32 to vector<8x128xf32>
    %16 = arith.addf %15, %14 : vector<8x128xf32>
    %17 = arith.divf %15, %16 : vector<8x128xf32>
    %18 = vector.extract_strided_slice %17 {offsets = [0, 0], sizes = [8, 32], strides = [1, 1]} : vector<8x128xf32> to vector<8x32xf32>
    %19 = vector.extract_strided_slice %17 {offsets = [0, 32], sizes = [8, 32], strides = [1, 1]} : vector<8x128xf32> to vector<8x32xf32>
    %20 = vector.extract_strided_slice %17 {offsets = [0, 96], sizes = [8, 32], strides = [1, 1]} : vector<8x128xf32> to vector<8x32xf32>
    %21 = vector.extract_strided_slice %12 {offsets = [0, 64], sizes = [8, 32], strides = [1, 1]} : vector<8x128xf32> to vector<8x32xf32>
    %22 = math.tanh %21 : vector<8x32xf32>
    %23 = arith.mulf %19, %8 : vector<8x32xf32>
    %24 = arith.mulf %18, %22 : vector<8x32xf32>
    %25 = arith.addf %23, %24 : vector<8x32xf32>
    %26 = math.tanh %25 : vector<8x32xf32>
    %27 = arith.mulf %20, %26 : vector<8x32xf32>
    %cst_12 = arith.constant dense<0.000000e+00> : vector<8x128xf32>
    %28 = tpu.matmul %8, %7, %cst_12 {dimension_numbers = #tpu.dot_dimension_numbers<[1], [0], [0], [1], [0, 0, 1, 1], [], []>} : vector<8x32xf32>, vector<32x128xf32>, vector<8x128xf32> -> vector<8x128xf32>
    %29 = arith.addf %10, %28 : vector<8x128xf32>
    %30 = arith.negf %29 : vector<8x128xf32>
    %31 = math.exp %30 : vector<8x128xf32>
    %cst_13 = arith.constant 1.000000e+00 : f32
    %32 = vector.broadcast %cst_13 : f32 to vector<8x128xf32>
    %33 = arith.addf %32, %31 : vector<8x128xf32>
    %34 = arith.divf %32, %33 : vector<8x128xf32>
    %35 = vector.extract_strided_slice %34 {offsets = [0, 0], sizes = [8, 32], strides = [1, 1]} : vector<8x128xf32> to vector<8x32xf32>
    %36 = vector.extract_strided_slice %34 {offsets = [0, 32], sizes = [8, 32], strides = [1, 1]} : vector<8x128xf32> to vector<8x32xf32>
    %37 = vector.extract_strided_slice %34 {offsets = [0, 96], sizes = [8, 32], strides = [1, 1]} : vector<8x128xf32> to vector<8x32xf32>
    %38 = vector.extract_strided_slice %29 {offsets = [0, 64], sizes = [8, 32], strides = [1, 1]} : vector<8x128xf32> to vector<8x32xf32>
    %39 = math.tanh %38 : vector<8x32xf32>
    %40 = arith.mulf %36, %8 : vector<8x32xf32>
    %41 = arith.mulf %35, %39 : vector<8x32xf32>
    %42 = arith.addf %40, %41 : vector<8x32xf32>
    %43 = math.tanh %42 : vector<8x32xf32>
    %44 = arith.mulf %37, %43 : vector<8x32xf32>
    %45 = vector.extract_strided_slice %5 {offsets = [8, 0], sizes = [8, 128], strides = [1, 1]} : vector<64x256xf32> to vector<8x128xf32>
    %46 = vector.extract_strided_slice %5 {offsets = [48, 128], sizes = [8, 128], strides = [1, 1]} : vector<64x256xf32> to vector<8x128xf32>
    %cst_14 = arith.constant dense<0.000000e+00> : vector<8x128xf32>
    %47 = tpu.matmul %27, %6, %cst_14 {dimension_numbers = #tpu.dot_dimension_numbers<[1], [0], [0], [1], [0, 0, 1, 1], [], []>} : vector<8x32xf32>, vector<32x128xf32>, vector<8x128xf32> -> vector<8x128xf32>
    %48 = arith.addf %45, %47 : vector<8x128xf32>
    %49 = arith.negf %48 : vector<8x128xf32>
    %50 = math.exp %49 : vector<8x128xf32>
    %cst_15 = arith.constant 1.000000e+00 : f32
    %51 = vector.broadcast %cst_15 : f32 to vector<8x128xf32>
    %52 = arith.addf %51, %50 : vector<8x128xf32>
    %53 = arith.divf %51, %52 : vector<8x128xf32>
    %54 = vector.extract_strided_slice %53 {offsets = [0, 0], sizes = [8, 32], strides = [1, 1]} : vector<8x128xf32> to vector<8x32xf32>
    %55 = vector.extract_strided_slice %53 {offsets = [0, 32], sizes = [8, 32], strides = [1, 1]} : vector<8x128xf32> to vector<8x32xf32>
    %56 = vector.extract_strided_slice %53 {offsets = [0, 96], sizes = [8, 32], strides = [1, 1]} : vector<8x128xf32> to vector<8x32xf32>
    %57 = vector.extract_strided_slice %48 {offsets = [0, 64], sizes = [8, 32], strides = [1, 1]} : vector<8x128xf32> to vector<8x32xf32>
    %58 = math.tanh %57 : vector<8x32xf32>
    %59 = arith.mulf %55, %25 : vector<8x32xf32>
    %60 = arith.mulf %54, %58 : vector<8x32xf32>
    %61 = arith.addf %59, %60 : vector<8x32xf32>
    %62 = math.tanh %61 : vector<8x32xf32>
    %63 = arith.mulf %56, %62 : vector<8x32xf32>
    %cst_16 = arith.constant dense<0.000000e+00> : vector<8x128xf32>
    %64 = tpu.matmul %44, %7, %cst_16 {dimension_numbers = #tpu.dot_dimension_numbers<[1], [0], [0], [1], [0, 0, 1, 1], [], []>} : vector<8x32xf32>, vector<32x128xf32>, vector<8x128xf32> -> vector<8x128xf32>
    %65 = arith.addf %46, %64 : vector<8x128xf32>
    %66 = arith.negf %65 : vector<8x128xf32>
    %67 = math.exp %66 : vector<8x128xf32>
    %cst_17 = arith.constant 1.000000e+00 : f32
    %68 = vector.broadcast %cst_17 : f32 to vector<8x128xf32>
    %69 = arith.addf %68, %67 : vector<8x128xf32>
    %70 = arith.divf %68, %69 : vector<8x128xf32>
    %71 = vector.extract_strided_slice %70 {offsets = [0, 0], sizes = [8, 32], strides = [1, 1]} : vector<8x128xf32> to vector<8x32xf32>
    %72 = vector.extract_strided_slice %70 {offsets = [0, 32], sizes = [8, 32], strides = [1, 1]} : vector<8x128xf32> to vector<8x32xf32>
    %73 = vector.extract_strided_slice %70 {offsets = [0, 96], sizes = [8, 32], strides = [1, 1]} : vector<8x128xf32> to vector<8x32xf32>
    %74 = vector.extract_strided_slice %65 {offsets = [0, 64], sizes = [8, 32], strides = [1, 1]} : vector<8x128xf32> to vector<8x32xf32>
    %75 = math.tanh %74 : vector<8x32xf32>
    %76 = arith.mulf %72, %42 : vector<8x32xf32>
    %77 = arith.mulf %71, %75 : vector<8x32xf32>
    %78 = arith.addf %76, %77 : vector<8x32xf32>
    %79 = math.tanh %78 : vector<8x32xf32>
    %80 = arith.mulf %73, %79 : vector<8x32xf32>
    %81 = vector.extract_strided_slice %5 {offsets = [16, 0], sizes = [8, 128], strides = [1, 1]} : vector<64x256xf32> to vector<8x128xf32>
    %82 = vector.extract_strided_slice %5 {offsets = [40, 128], sizes = [8, 128], strides = [1, 1]} : vector<64x256xf32> to vector<8x128xf32>
    %cst_18 = arith.constant dense<0.000000e+00> : vector<8x128xf32>
    %83 = tpu.matmul %63, %6, %cst_18 {dimension_numbers = #tpu.dot_dimension_numbers<[1], [0], [0], [1], [0, 0, 1, 1], [], []>} : vector<8x32xf32>, vector<32x128xf32>, vector<8x128xf32> -> vector<8x128xf32>
    %84 = arith.addf %81, %83 : vector<8x128xf32>
    %85 = arith.negf %84 : vector<8x128xf32>
    %86 = math.exp %85 : vector<8x128xf32>
    %cst_19 = arith.constant 1.000000e+00 : f32
    %87 = vector.broadcast %cst_19 : f32 to vector<8x128xf32>
    %88 = arith.addf %87, %86 : vector<8x128xf32>
    %89 = arith.divf %87, %88 : vector<8x128xf32>
    %90 = vector.extract_strided_slice %89 {offsets = [0, 0], sizes = [8, 32], strides = [1, 1]} : vector<8x128xf32> to vector<8x32xf32>
    %91 = vector.extract_strided_slice %89 {offsets = [0, 32], sizes = [8, 32], strides = [1, 1]} : vector<8x128xf32> to vector<8x32xf32>
    %92 = vector.extract_strided_slice %89 {offsets = [0, 96], sizes = [8, 32], strides = [1, 1]} : vector<8x128xf32> to vector<8x32xf32>
    %93 = vector.extract_strided_slice %84 {offsets = [0, 64], sizes = [8, 32], strides = [1, 1]} : vector<8x128xf32> to vector<8x32xf32>
    %94 = math.tanh %93 : vector<8x32xf32>
    %95 = arith.mulf %91, %61 : vector<8x32xf32>
    %96 = arith.mulf %90, %94 : vector<8x32xf32>
    %97 = arith.addf %95, %96 : vector<8x32xf32>
    %98 = math.tanh %97 : vector<8x32xf32>
    %99 = arith.mulf %92, %98 : vector<8x32xf32>
    %cst_20 = arith.constant dense<0.000000e+00> : vector<8x128xf32>
    %100 = tpu.matmul %80, %7, %cst_20 {dimension_numbers = #tpu.dot_dimension_numbers<[1], [0], [0], [1], [0, 0, 1, 1], [], []>} : vector<8x32xf32>, vector<32x128xf32>, vector<8x128xf32> -> vector<8x128xf32>
    %101 = arith.addf %82, %100 : vector<8x128xf32>
    %102 = arith.negf %101 : vector<8x128xf32>
    %103 = math.exp %102 : vector<8x128xf32>
    %cst_21 = arith.constant 1.000000e+00 : f32
    %104 = vector.broadcast %cst_21 : f32 to vector<8x128xf32>
    %105 = arith.addf %104, %103 : vector<8x128xf32>
    %106 = arith.divf %104, %105 : vector<8x128xf32>
    %107 = vector.extract_strided_slice %106 {offsets = [0, 0], sizes = [8, 32], strides = [1, 1]} : vector<8x128xf32> to vector<8x32xf32>
    %108 = vector.extract_strided_slice %106 {offsets = [0, 32], sizes = [8, 32], strides = [1, 1]} : vector<8x128xf32> to vector<8x32xf32>
    %109 = vector.extract_strided_slice %106 {offsets = [0, 96], sizes = [8, 32], strides = [1, 1]} : vector<8x128xf32> to vector<8x32xf32>
    %110 = vector.extract_strided_slice %101 {offsets = [0, 64], sizes = [8, 32], strides = [1, 1]} : vector<8x128xf32> to vector<8x32xf32>
    %111 = math.tanh %110 : vector<8x32xf32>
    %112 = arith.mulf %108, %78 : vector<8x32xf32>
    %113 = arith.mulf %107, %111 : vector<8x32xf32>
    %114 = arith.addf %112, %113 : vector<8x32xf32>
    %115 = math.tanh %114 : vector<8x32xf32>
    %116 = arith.mulf %109, %115 : vector<8x32xf32>
    %117 = vector.extract_strided_slice %5 {offsets = [24, 0], sizes = [8, 128], strides = [1, 1]} : vector<64x256xf32> to vector<8x128xf32>
    %118 = vector.extract_strided_slice %5 {offsets = [32, 128], sizes = [8, 128], strides = [1, 1]} : vector<64x256xf32> to vector<8x128xf32>
    %cst_22 = arith.constant dense<0.000000e+00> : vector<8x128xf32>
    %119 = tpu.matmul %99, %6, %cst_22 {dimension_numbers = #tpu.dot_dimension_numbers<[1], [0], [0], [1], [0, 0, 1, 1], [], []>} : vector<8x32xf32>, vector<32x128xf32>, vector<8x128xf32> -> vector<8x128xf32>
    %120 = arith.addf %117, %119 : vector<8x128xf32>
    %121 = arith.negf %120 : vector<8x128xf32>
    %122 = math.exp %121 : vector<8x128xf32>
    %cst_23 = arith.constant 1.000000e+00 : f32
    %123 = vector.broadcast %cst_23 : f32 to vector<8x128xf32>
    %124 = arith.addf %123, %122 : vector<8x128xf32>
    %125 = arith.divf %123, %124 : vector<8x128xf32>
    %126 = vector.extract_strided_slice %125 {offsets = [0, 0], sizes = [8, 32], strides = [1, 1]} : vector<8x128xf32> to vector<8x32xf32>
    %127 = vector.extract_strided_slice %125 {offsets = [0, 32], sizes = [8, 32], strides = [1, 1]} : vector<8x128xf32> to vector<8x32xf32>
    %128 = vector.extract_strided_slice %125 {offsets = [0, 96], sizes = [8, 32], strides = [1, 1]} : vector<8x128xf32> to vector<8x32xf32>
    %129 = vector.extract_strided_slice %120 {offsets = [0, 64], sizes = [8, 32], strides = [1, 1]} : vector<8x128xf32> to vector<8x32xf32>
    %130 = math.tanh %129 : vector<8x32xf32>
    %131 = arith.mulf %127, %97 : vector<8x32xf32>
    %132 = arith.mulf %126, %130 : vector<8x32xf32>
    %133 = arith.addf %131, %132 : vector<8x32xf32>
    %134 = math.tanh %133 : vector<8x32xf32>
    %135 = arith.mulf %128, %134 : vector<8x32xf32>
    %cst_24 = arith.constant dense<0.000000e+00> : vector<8x128xf32>
    %136 = tpu.matmul %116, %7, %cst_24 {dimension_numbers = #tpu.dot_dimension_numbers<[1], [0], [0], [1], [0, 0, 1, 1], [], []>} : vector<8x32xf32>, vector<32x128xf32>, vector<8x128xf32> -> vector<8x128xf32>
    %137 = arith.addf %118, %136 : vector<8x128xf32>
    %138 = arith.negf %137 : vector<8x128xf32>
    %139 = math.exp %138 : vector<8x128xf32>
    %cst_25 = arith.constant 1.000000e+00 : f32
    %140 = vector.broadcast %cst_25 : f32 to vector<8x128xf32>
    %141 = arith.addf %140, %139 : vector<8x128xf32>
    %142 = arith.divf %140, %141 : vector<8x128xf32>
    %143 = vector.extract_strided_slice %142 {offsets = [0, 0], sizes = [8, 32], strides = [1, 1]} : vector<8x128xf32> to vector<8x32xf32>
    %144 = vector.extract_strided_slice %142 {offsets = [0, 32], sizes = [8, 32], strides = [1, 1]} : vector<8x128xf32> to vector<8x32xf32>
    %145 = vector.extract_strided_slice %142 {offsets = [0, 96], sizes = [8, 32], strides = [1, 1]} : vector<8x128xf32> to vector<8x32xf32>
    %146 = vector.extract_strided_slice %137 {offsets = [0, 64], sizes = [8, 32], strides = [1, 1]} : vector<8x128xf32> to vector<8x32xf32>
    %147 = math.tanh %146 : vector<8x32xf32>
    %148 = arith.mulf %144, %114 : vector<8x32xf32>
    %149 = arith.mulf %143, %147 : vector<8x32xf32>
    %150 = arith.addf %148, %149 : vector<8x32xf32>
    %151 = math.tanh %150 : vector<8x32xf32>
    %152 = arith.mulf %145, %151 : vector<8x32xf32>
    %153 = vector.extract_strided_slice %5 {offsets = [32, 0], sizes = [8, 128], strides = [1, 1]} : vector<64x256xf32> to vector<8x128xf32>
    %154 = vector.extract_strided_slice %5 {offsets = [24, 128], sizes = [8, 128], strides = [1, 1]} : vector<64x256xf32> to vector<8x128xf32>
    %cst_26 = arith.constant dense<0.000000e+00> : vector<8x128xf32>
    %155 = tpu.matmul %135, %6, %cst_26 {dimension_numbers = #tpu.dot_dimension_numbers<[1], [0], [0], [1], [0, 0, 1, 1], [], []>} : vector<8x32xf32>, vector<32x128xf32>, vector<8x128xf32> -> vector<8x128xf32>
    %156 = arith.addf %153, %155 : vector<8x128xf32>
    %157 = arith.negf %156 : vector<8x128xf32>
    %158 = math.exp %157 : vector<8x128xf32>
    %cst_27 = arith.constant 1.000000e+00 : f32
    %159 = vector.broadcast %cst_27 : f32 to vector<8x128xf32>
    %160 = arith.addf %159, %158 : vector<8x128xf32>
    %161 = arith.divf %159, %160 : vector<8x128xf32>
    %162 = vector.extract_strided_slice %161 {offsets = [0, 0], sizes = [8, 32], strides = [1, 1]} : vector<8x128xf32> to vector<8x32xf32>
    %163 = vector.extract_strided_slice %161 {offsets = [0, 32], sizes = [8, 32], strides = [1, 1]} : vector<8x128xf32> to vector<8x32xf32>
    %164 = vector.extract_strided_slice %161 {offsets = [0, 96], sizes = [8, 32], strides = [1, 1]} : vector<8x128xf32> to vector<8x32xf32>
    %165 = vector.extract_strided_slice %156 {offsets = [0, 64], sizes = [8, 32], strides = [1, 1]} : vector<8x128xf32> to vector<8x32xf32>
    %166 = math.tanh %165 : vector<8x32xf32>
    %167 = arith.mulf %163, %133 : vector<8x32xf32>
    %168 = arith.mulf %162, %166 : vector<8x32xf32>
    %169 = arith.addf %167, %168 : vector<8x32xf32>
    %170 = math.tanh %169 : vector<8x32xf32>
    %171 = arith.mulf %164, %170 : vector<8x32xf32>
    %cst_28 = arith.constant dense<0.000000e+00> : vector<8x128xf32>
    %172 = tpu.matmul %152, %7, %cst_28 {dimension_numbers = #tpu.dot_dimension_numbers<[1], [0], [0], [1], [0, 0, 1, 1], [], []>} : vector<8x32xf32>, vector<32x128xf32>, vector<8x128xf32> -> vector<8x128xf32>
    %173 = arith.addf %154, %172 : vector<8x128xf32>
    %174 = arith.negf %173 : vector<8x128xf32>
    %175 = math.exp %174 : vector<8x128xf32>
    %cst_29 = arith.constant 1.000000e+00 : f32
    %176 = vector.broadcast %cst_29 : f32 to vector<8x128xf32>
    %177 = arith.addf %176, %175 : vector<8x128xf32>
    %178 = arith.divf %176, %177 : vector<8x128xf32>
    %179 = vector.extract_strided_slice %178 {offsets = [0, 0], sizes = [8, 32], strides = [1, 1]} : vector<8x128xf32> to vector<8x32xf32>
    %180 = vector.extract_strided_slice %178 {offsets = [0, 32], sizes = [8, 32], strides = [1, 1]} : vector<8x128xf32> to vector<8x32xf32>
    %181 = vector.extract_strided_slice %178 {offsets = [0, 96], sizes = [8, 32], strides = [1, 1]} : vector<8x128xf32> to vector<8x32xf32>
    %182 = vector.extract_strided_slice %173 {offsets = [0, 64], sizes = [8, 32], strides = [1, 1]} : vector<8x128xf32> to vector<8x32xf32>
    %183 = math.tanh %182 : vector<8x32xf32>
    %184 = arith.mulf %180, %150 : vector<8x32xf32>
    %185 = arith.mulf %179, %183 : vector<8x32xf32>
    %186 = arith.addf %184, %185 : vector<8x32xf32>
    %187 = math.tanh %186 : vector<8x32xf32>
    %188 = arith.mulf %181, %187 : vector<8x32xf32>
    %189 = vector.extract_strided_slice %5 {offsets = [40, 0], sizes = [8, 128], strides = [1, 1]} : vector<64x256xf32> to vector<8x128xf32>
    %190 = vector.extract_strided_slice %5 {offsets = [16, 128], sizes = [8, 128], strides = [1, 1]} : vector<64x256xf32> to vector<8x128xf32>
    %cst_30 = arith.constant dense<0.000000e+00> : vector<8x128xf32>
    %191 = tpu.matmul %171, %6, %cst_30 {dimension_numbers = #tpu.dot_dimension_numbers<[1], [0], [0], [1], [0, 0, 1, 1], [], []>} : vector<8x32xf32>, vector<32x128xf32>, vector<8x128xf32> -> vector<8x128xf32>
    %192 = arith.addf %189, %191 : vector<8x128xf32>
    %193 = arith.negf %192 : vector<8x128xf32>
    %194 = math.exp %193 : vector<8x128xf32>
    %cst_31 = arith.constant 1.000000e+00 : f32
    %195 = vector.broadcast %cst_31 : f32 to vector<8x128xf32>
    %196 = arith.addf %195, %194 : vector<8x128xf32>
    %197 = arith.divf %195, %196 : vector<8x128xf32>
    %198 = vector.extract_strided_slice %197 {offsets = [0, 0], sizes = [8, 32], strides = [1, 1]} : vector<8x128xf32> to vector<8x32xf32>
    %199 = vector.extract_strided_slice %197 {offsets = [0, 32], sizes = [8, 32], strides = [1, 1]} : vector<8x128xf32> to vector<8x32xf32>
    %200 = vector.extract_strided_slice %197 {offsets = [0, 96], sizes = [8, 32], strides = [1, 1]} : vector<8x128xf32> to vector<8x32xf32>
    %201 = vector.extract_strided_slice %192 {offsets = [0, 64], sizes = [8, 32], strides = [1, 1]} : vector<8x128xf32> to vector<8x32xf32>
    %202 = math.tanh %201 : vector<8x32xf32>
    %203 = arith.mulf %199, %169 : vector<8x32xf32>
    %204 = arith.mulf %198, %202 : vector<8x32xf32>
    %205 = arith.addf %203, %204 : vector<8x32xf32>
    %206 = math.tanh %205 : vector<8x32xf32>
    %207 = arith.mulf %200, %206 : vector<8x32xf32>
    %cst_32 = arith.constant dense<0.000000e+00> : vector<8x128xf32>
    %208 = tpu.matmul %188, %7, %cst_32 {dimension_numbers = #tpu.dot_dimension_numbers<[1], [0], [0], [1], [0, 0, 1, 1], [], []>} : vector<8x32xf32>, vector<32x128xf32>, vector<8x128xf32> -> vector<8x128xf32>
    %209 = arith.addf %190, %208 : vector<8x128xf32>
    %210 = arith.negf %209 : vector<8x128xf32>
    %211 = math.exp %210 : vector<8x128xf32>
    %cst_33 = arith.constant 1.000000e+00 : f32
    %212 = vector.broadcast %cst_33 : f32 to vector<8x128xf32>
    %213 = arith.addf %212, %211 : vector<8x128xf32>
    %214 = arith.divf %212, %213 : vector<8x128xf32>
    %215 = vector.extract_strided_slice %214 {offsets = [0, 0], sizes = [8, 32], strides = [1, 1]} : vector<8x128xf32> to vector<8x32xf32>
    %216 = vector.extract_strided_slice %214 {offsets = [0, 32], sizes = [8, 32], strides = [1, 1]} : vector<8x128xf32> to vector<8x32xf32>
    %217 = vector.extract_strided_slice %214 {offsets = [0, 96], sizes = [8, 32], strides = [1, 1]} : vector<8x128xf32> to vector<8x32xf32>
    %218 = vector.extract_strided_slice %209 {offsets = [0, 64], sizes = [8, 32], strides = [1, 1]} : vector<8x128xf32> to vector<8x32xf32>
    %219 = math.tanh %218 : vector<8x32xf32>
    %220 = arith.mulf %216, %186 : vector<8x32xf32>
    %221 = arith.mulf %215, %219 : vector<8x32xf32>
    %222 = arith.addf %220, %221 : vector<8x32xf32>
    %223 = math.tanh %222 : vector<8x32xf32>
    %224 = arith.mulf %217, %223 : vector<8x32xf32>
    %225 = vector.extract_strided_slice %5 {offsets = [48, 0], sizes = [8, 128], strides = [1, 1]} : vector<64x256xf32> to vector<8x128xf32>
    %226 = vector.extract_strided_slice %5 {offsets = [8, 128], sizes = [8, 128], strides = [1, 1]} : vector<64x256xf32> to vector<8x128xf32>
    %cst_34 = arith.constant dense<0.000000e+00> : vector<8x128xf32>
    %227 = tpu.matmul %207, %6, %cst_34 {dimension_numbers = #tpu.dot_dimension_numbers<[1], [0], [0], [1], [0, 0, 1, 1], [], []>} : vector<8x32xf32>, vector<32x128xf32>, vector<8x128xf32> -> vector<8x128xf32>
    %228 = arith.addf %225, %227 : vector<8x128xf32>
    %229 = arith.negf %228 : vector<8x128xf32>
    %230 = math.exp %229 : vector<8x128xf32>
    %cst_35 = arith.constant 1.000000e+00 : f32
    %231 = vector.broadcast %cst_35 : f32 to vector<8x128xf32>
    %232 = arith.addf %231, %230 : vector<8x128xf32>
    %233 = arith.divf %231, %232 : vector<8x128xf32>
    %234 = vector.extract_strided_slice %233 {offsets = [0, 0], sizes = [8, 32], strides = [1, 1]} : vector<8x128xf32> to vector<8x32xf32>
    %235 = vector.extract_strided_slice %233 {offsets = [0, 32], sizes = [8, 32], strides = [1, 1]} : vector<8x128xf32> to vector<8x32xf32>
    %236 = vector.extract_strided_slice %233 {offsets = [0, 96], sizes = [8, 32], strides = [1, 1]} : vector<8x128xf32> to vector<8x32xf32>
    %237 = vector.extract_strided_slice %228 {offsets = [0, 64], sizes = [8, 32], strides = [1, 1]} : vector<8x128xf32> to vector<8x32xf32>
    %238 = math.tanh %237 : vector<8x32xf32>
    %239 = arith.mulf %235, %205 : vector<8x32xf32>
    %240 = arith.mulf %234, %238 : vector<8x32xf32>
    %241 = arith.addf %239, %240 : vector<8x32xf32>
    %242 = math.tanh %241 : vector<8x32xf32>
    %243 = arith.mulf %236, %242 : vector<8x32xf32>
    %cst_36 = arith.constant dense<0.000000e+00> : vector<8x128xf32>
    %244 = tpu.matmul %224, %7, %cst_36 {dimension_numbers = #tpu.dot_dimension_numbers<[1], [0], [0], [1], [0, 0, 1, 1], [], []>} : vector<8x32xf32>, vector<32x128xf32>, vector<8x128xf32> -> vector<8x128xf32>
    %245 = arith.addf %226, %244 : vector<8x128xf32>
    %246 = arith.negf %245 : vector<8x128xf32>
    %247 = math.exp %246 : vector<8x128xf32>
    %cst_37 = arith.constant 1.000000e+00 : f32
    %248 = vector.broadcast %cst_37 : f32 to vector<8x128xf32>
    %249 = arith.addf %248, %247 : vector<8x128xf32>
    %250 = arith.divf %248, %249 : vector<8x128xf32>
    %251 = vector.extract_strided_slice %250 {offsets = [0, 0], sizes = [8, 32], strides = [1, 1]} : vector<8x128xf32> to vector<8x32xf32>
    %252 = vector.extract_strided_slice %250 {offsets = [0, 32], sizes = [8, 32], strides = [1, 1]} : vector<8x128xf32> to vector<8x32xf32>
    %253 = vector.extract_strided_slice %250 {offsets = [0, 96], sizes = [8, 32], strides = [1, 1]} : vector<8x128xf32> to vector<8x32xf32>
    %254 = vector.extract_strided_slice %245 {offsets = [0, 64], sizes = [8, 32], strides = [1, 1]} : vector<8x128xf32> to vector<8x32xf32>
    %255 = math.tanh %254 : vector<8x32xf32>
    %256 = arith.mulf %252, %222 : vector<8x32xf32>
    %257 = arith.mulf %251, %255 : vector<8x32xf32>
    %258 = arith.addf %256, %257 : vector<8x32xf32>
    %259 = math.tanh %258 : vector<8x32xf32>
    %260 = arith.mulf %253, %259 : vector<8x32xf32>
    %261 = vector.extract_strided_slice %5 {offsets = [56, 0], sizes = [8, 128], strides = [1, 1]} : vector<64x256xf32> to vector<8x128xf32>
    %262 = vector.extract_strided_slice %5 {offsets = [0, 128], sizes = [8, 128], strides = [1, 1]} : vector<64x256xf32> to vector<8x128xf32>
    %cst_38 = arith.constant dense<0.000000e+00> : vector<8x128xf32>
    %263 = tpu.matmul %243, %6, %cst_38 {dimension_numbers = #tpu.dot_dimension_numbers<[1], [0], [0], [1], [0, 0, 1, 1], [], []>} : vector<8x32xf32>, vector<32x128xf32>, vector<8x128xf32> -> vector<8x128xf32>
    %264 = arith.addf %261, %263 : vector<8x128xf32>
    %265 = arith.negf %264 : vector<8x128xf32>
    %266 = math.exp %265 : vector<8x128xf32>
    %cst_39 = arith.constant 1.000000e+00 : f32
    %267 = vector.broadcast %cst_39 : f32 to vector<8x128xf32>
    %268 = arith.addf %267, %266 : vector<8x128xf32>
    %269 = arith.divf %267, %268 : vector<8x128xf32>
    %270 = vector.extract_strided_slice %269 {offsets = [0, 0], sizes = [8, 32], strides = [1, 1]} : vector<8x128xf32> to vector<8x32xf32>
    %271 = vector.extract_strided_slice %269 {offsets = [0, 32], sizes = [8, 32], strides = [1, 1]} : vector<8x128xf32> to vector<8x32xf32>
    %272 = vector.extract_strided_slice %269 {offsets = [0, 96], sizes = [8, 32], strides = [1, 1]} : vector<8x128xf32> to vector<8x32xf32>
    %273 = vector.extract_strided_slice %264 {offsets = [0, 64], sizes = [8, 32], strides = [1, 1]} : vector<8x128xf32> to vector<8x32xf32>
    %274 = math.tanh %273 : vector<8x32xf32>
    %275 = arith.mulf %271, %241 : vector<8x32xf32>
    %276 = arith.mulf %270, %274 : vector<8x32xf32>
    %277 = arith.addf %275, %276 : vector<8x32xf32>
    %278 = math.tanh %277 : vector<8x32xf32>
    %279 = arith.mulf %272, %278 : vector<8x32xf32>
    %cst_40 = arith.constant dense<0.000000e+00> : vector<8x128xf32>
    %280 = tpu.matmul %260, %7, %cst_40 {dimension_numbers = #tpu.dot_dimension_numbers<[1], [0], [0], [1], [0, 0, 1, 1], [], []>} : vector<8x32xf32>, vector<32x128xf32>, vector<8x128xf32> -> vector<8x128xf32>
    %281 = arith.addf %262, %280 : vector<8x128xf32>
    %282 = arith.negf %281 : vector<8x128xf32>
    %283 = math.exp %282 : vector<8x128xf32>
    %cst_41 = arith.constant 1.000000e+00 : f32
    %284 = vector.broadcast %cst_41 : f32 to vector<8x128xf32>
    %285 = arith.addf %284, %283 : vector<8x128xf32>
    %286 = arith.divf %284, %285 : vector<8x128xf32>
    %287 = vector.extract_strided_slice %286 {offsets = [0, 0], sizes = [8, 32], strides = [1, 1]} : vector<8x128xf32> to vector<8x32xf32>
    %288 = vector.extract_strided_slice %286 {offsets = [0, 32], sizes = [8, 32], strides = [1, 1]} : vector<8x128xf32> to vector<8x32xf32>
    %289 = vector.extract_strided_slice %286 {offsets = [0, 96], sizes = [8, 32], strides = [1, 1]} : vector<8x128xf32> to vector<8x32xf32>
    %290 = vector.extract_strided_slice %281 {offsets = [0, 64], sizes = [8, 32], strides = [1, 1]} : vector<8x128xf32> to vector<8x32xf32>
    %291 = math.tanh %290 : vector<8x32xf32>
    %292 = arith.mulf %288, %258 : vector<8x32xf32>
    %293 = arith.mulf %287, %291 : vector<8x32xf32>
    %294 = arith.addf %292, %293 : vector<8x32xf32>
    %295 = math.tanh %294 : vector<8x32xf32>
    %296 = arith.mulf %289, %295 : vector<8x32xf32>
    %297 = tpu.concatenate %279, %296 in 1 : vector<8x32xf32>, vector<8x32xf32> -> vector<8x64xf32>
    %c0_42 = arith.constant 0 : index
    %c0_43 = arith.constant 0 : index
    %298 = vector.load %arg9[%c0_42, %c0_43] : memref<8x8xf32, #tpu.memory_space<vmem>>, vector<8x8xf32>
    %c0_44 = arith.constant 0 : index
    %c0_45 = arith.constant 0 : index
    %299 = vector.load %arg8[%c0_44, %c0_45] : memref<1x128xf32, #tpu.memory_space<vmem>>, vector<1x128xf32>
    %300 = vector.extract_strided_slice %299 {offsets = [0, 0], sizes = [1, 64], strides = [1, 1]} : vector<1x128xf32> to vector<1x64xf32>
    %301 = vector.extract_strided_slice %299 {offsets = [0, 64], sizes = [1, 64], strides = [1, 1]} : vector<1x128xf32> to vector<1x64xf32>
    %c0_46 = arith.constant 0 : index
    %c0_47 = arith.constant 0 : index
    %302 = vector.load %arg5[%c0_46, %c0_47] : memref<8x32xf32, #tpu.memory_space<vmem>>, vector<8x32xf32>
    %c0_48 = arith.constant 0 : index
    %c0_49 = arith.constant 0 : index
    %303 = vector.load %arg6[%c0_48, %c0_49] : memref<32x64xf32, #tpu.memory_space<vmem>>, vector<32x64xf32>
    %cst_50 = arith.constant dense<0.000000e+00> : vector<8x64xf32>
    %304 = tpu.matmul %302, %303, %cst_50 {dimension_numbers = #tpu.dot_dimension_numbers<[1], [0], [0], [1], [0, 0, 1, 1], [], []>} : vector<8x32xf32>, vector<32x64xf32>, vector<8x64xf32> -> vector<8x64xf32>
    %305 = vector.broadcast %300 : vector<1x64xf32> to vector<8x64xf32>
    %306 = arith.mulf %304, %305 : vector<8x64xf32>
    %cst_51 = arith.constant dense<0.000000e+00> : vector<8xf32>
    %307 = vector.multi_reduction <add>, %306, %cst_51 [1] : vector<8x64xf32> to vector<8xf32>
    %308 = vector.shape_cast %307 : vector<8xf32> to vector<8x1xf32>
    %cst_52 = arith.constant dense<0.000000e+00> : vector<1x8xf32>
    %309 = tpu.matmul %301, %304, %cst_52 {dimension_numbers = #tpu.dot_dimension_numbers<[1], [1], [0], [0], [0, 0, 1, 0], [], []>} : vector<1x64xf32>, vector<8x64xf32>, vector<1x8xf32> -> vector<1x8xf32>
    %310 = vector.broadcast %308 : vector<8x1xf32> to vector<8x8xf32>
    %311 = vector.broadcast %309 : vector<1x8xf32> to vector<8x8xf32>
    %312 = arith.addf %310, %311 : vector<8x8xf32>
    %cst_53 = arith.constant 0.000000e+00 : f32
    %313 = vector.broadcast %cst_53 : f32 to vector<8x8xf32>
    %314 = arith.cmpf oge, %312, %313 : vector<8x8xf32>
    %cst_54 = arith.constant 0.00999999977 : f32
    %315 = vector.broadcast %cst_54 : f32 to vector<8x8xf32>
    %316 = arith.mulf %315, %312 : vector<8x8xf32>
    %317 = arith.select %314, %312, %316 : vector<8x8xi1>, vector<8x8xf32>
    %318 = arith.mulf %317, %298 : vector<8x8xf32>
    %319 = math.tanh %318 : vector<8x8xf32>
    %cst_55 = arith.constant dense<0.000000e+00> : vector<8x64xf32>
    %320 = tpu.matmul %319, %304, %cst_55 {dimension_numbers = #tpu.dot_dimension_numbers<[1], [0], [0], [1], [0, 0, 1, 1], [], []>} : vector<8x8xf32>, vector<8x64xf32>, vector<8x64xf32> -> vector<8x64xf32>
    %cst_56 = arith.constant 0.000000e+00 : f32
    %321 = vector.broadcast %cst_56 : f32 to vector<8x64xf32>
    %322 = arith.cmpf oge, %320, %321 : vector<8x64xf32>
    %cst_57 = arith.constant 0.00999999977 : f32
    %323 = vector.broadcast %cst_57 : f32 to vector<8x64xf32>
    %324 = arith.mulf %323, %320 : vector<8x64xf32>
    %325 = arith.select %322, %320, %324 : vector<8x64xi1>, vector<8x64xf32>
    %c0_58 = arith.constant 0 : index
    %c0_59 = arith.constant 0 : index
    %326 = vector.load %arg7[%c0_58, %c0_59] : memref<64x64xf32, #tpu.memory_space<vmem>>, vector<64x64xf32>
    %cst_60 = arith.constant dense<0.000000e+00> : vector<8x64xf32>
    %327 = tpu.matmul %325, %326, %cst_60 {dimension_numbers = #tpu.dot_dimension_numbers<[1], [0], [0], [1], [0, 0, 1, 1], [], []>} : vector<8x64xf32>, vector<64x64xf32>, vector<8x64xf32> -> vector<8x64xf32>
    %328 = vector.broadcast %300 : vector<1x64xf32> to vector<8x64xf32>
    %329 = arith.mulf %327, %328 : vector<8x64xf32>
    %cst_61 = arith.constant dense<0.000000e+00> : vector<8xf32>
    %330 = vector.multi_reduction <add>, %329, %cst_61 [1] : vector<8x64xf32> to vector<8xf32>
    %331 = vector.shape_cast %330 : vector<8xf32> to vector<8x1xf32>
    %cst_62 = arith.constant dense<0.000000e+00> : vector<1x8xf32>
    %332 = tpu.matmul %301, %327, %cst_62 {dimension_numbers = #tpu.dot_dimension_numbers<[1], [1], [0], [0], [0, 0, 1, 0], [], []>} : vector<1x64xf32>, vector<8x64xf32>, vector<1x8xf32> -> vector<1x8xf32>
    %333 = vector.broadcast %331 : vector<8x1xf32> to vector<8x8xf32>
    %334 = vector.broadcast %332 : vector<1x8xf32> to vector<8x8xf32>
    %335 = arith.addf %333, %334 : vector<8x8xf32>
    %cst_63 = arith.constant 0.000000e+00 : f32
    %336 = vector.broadcast %cst_63 : f32 to vector<8x8xf32>
    %337 = arith.cmpf oge, %335, %336 : vector<8x8xf32>
    %cst_64 = arith.constant 0.00999999977 : f32
    %338 = vector.broadcast %cst_64 : f32 to vector<8x8xf32>
    %339 = arith.mulf %338, %335 : vector<8x8xf32>
    %340 = arith.select %337, %335, %339 : vector<8x8xi1>, vector<8x8xf32>
    %341 = arith.mulf %340, %298 : vector<8x8xf32>
    %342 = math.tanh %341 : vector<8x8xf32>
    %cst_65 = arith.constant dense<0.000000e+00> : vector<8x64xf32>
    %343 = tpu.matmul %342, %327, %cst_65 {dimension_numbers = #tpu.dot_dimension_numbers<[1], [0], [0], [1], [0, 0, 1, 1], [], []>} : vector<8x8xf32>, vector<8x64xf32>, vector<8x64xf32> -> vector<8x64xf32>
    %cst_66 = arith.constant 0.000000e+00 : f32
    %344 = vector.broadcast %cst_66 : f32 to vector<8x64xf32>
    %345 = arith.cmpf oge, %343, %344 : vector<8x64xf32>
    %cst_67 = arith.constant 0.00999999977 : f32
    %346 = vector.broadcast %cst_67 : f32 to vector<8x64xf32>
    %347 = arith.mulf %346, %343 : vector<8x64xf32>
    %348 = arith.select %345, %343, %347 : vector<8x64xi1>, vector<8x64xf32>
    %cst_68 = arith.constant dense<0.000000e+00> : vector<8x8xf32>
    %349 = tpu.matmul %297, %348, %cst_68 {dimension_numbers = #tpu.dot_dimension_numbers<[1], [1], [0], [0], [0, 0, 1, 0], [], []>} : vector<8x64xf32>, vector<8x64xf32>, vector<8x8xf32> -> vector<8x8xf32>
    %c0_69 = arith.constant 0 : index
    %c0_70 = arith.constant 0 : index
    %350 = vector.load %arg10[%c0_69, %c0_70] : memref<8x8xf32, #tpu.memory_space<vmem>>, vector<8x8xf32>
    tpu.vector_store %arg10[%c0_69, %c0_70], %349 {strides = array<i32>} : memref<8x8xf32, #tpu.memory_space<vmem>>, vector<8x8xf32>,
    return
  }
}

</mosaic_0001>

<bundles_post_ra>
// kernel: tpu_custom_call.1
= control target key start
LH: loop header
LB: loop body
LE: loop exit
PB: predicated region body
PF: predicated region fallthrough
CT: control target
= control target key end

     0   :  { %15 = vsyncpa [#allocation3], 0  ;;  %s3702_s0 = inlined_call_operand.vmem [shape: f32[64,32], index: 0, kind: input, shape index: {}]   ;;  %s3703_s1 = inlined_call_operand.vmem [shape: f32[32,256], index: 1, kind: input, shape index: {}]   ;;  %s3704_s2 = inlined_call_operand.vmem [shape: f32[1,256], index: 2, kind: input, shape index: {}]   ;;  %s3705_s3 = inlined_call_operand.vmem [shape: f32[32,128], index: 3, kind: input, shape index: {}]   ;;  %s3706_s4 = inlined_call_operand.hbm [shape: f32[32,128], index: 4, kind: input, shape index: {}]   ;;  %s3707_s5 = inlined_call_operand.vmem [shape: f32[8,32], index: 5, kind: input, shape index: {}]   ;;  %s3708_s6 = inlined_call_operand.hbm [shape: f32[32,64], index: 6, kind: input, shape index: {}]   ;;  %s3709_s7 = inlined_call_operand.hbm [shape: f32[64,64], index: 7, kind: input, shape index: {}]   ;;  %s3710_s8 = inlined_call_operand.vmem [shape: f32[1,128], index: 8, kind: input, shape index: {}]   ;;  %s3711_s9 = inlined_call_operand.vmem [shape: f32[8,8], index: 9, kind: input, shape index: {}]   ;;  %s3712_s10 = inlined_call_operand.hbm [shape: f32[8,8], index: 10, kind: output, shape index: {}]  }
   0x1   :  { %16 = vsyncpa [#allocation6], 0 }
   0x2   :  { %17 = vsyncpa [#allocation4], 0  ;;  %s3188_s13 = smov [#allocation5]   ;;  %s3189_s15 = smov [#allocation2]  }
   0x3   :  { %s45_s14 = sshll.u32 %s3188_s13, 4  ;;  %s31_s16 = sshll.u32 %s3189_s15, 4  ;;  %s46_s14 = int_to_ptr.vmem [resolvable:$true] %s45_s14  ;;  %s3254_s16 = int_to_ptr.vmem [resolvable:$true] %s31_s16 }
   0x4   :  { %s3094_s19 = scalar_lea.hbm %s3708_s6, 512 }
   0x5   :  { %p3095_p0 = scmp.ne.s32.totalorder %s3708_s6, %s3094_s19  ;;  %p3098_p1 = scmp.lt.u32.totalorder %s3094_s19, %s3708_s6 }
   0x7   :  { %p3100_p2 = pnand %p3098_p1, %p3095_p0 }
   0x9   :  { %3103 = shalt.err (!%p3100_p2)
}
   0xa   :  { %s3104_s24 = scalar_lea.vmem %s46_s14, 512  ;;  %p3109_p4 = scmp.lt.s32.totalorder %s46_s14, %s46_s14 }
   0xb   :  { %p3105_p3 = scmp.ne.s32.totalorder %s46_s14, %s3104_s24  ;;  %p3110_p5 = scmp.lt.s32.totalorder %s3104_s24, %s3104_s24 }
   0xd   :  { %p3111_p6 = por %p3110_p5, %p3109_p4 }
   0xf   :  { %p3112_p7 = pnand %p3111_p6, %p3105_p3 }
  0x11   :  { %3115 = shalt.err (!%p3112_p7)
}
  0x12   :  { %s3190_s25 = smov 128   ;;  %s3191_s26 = smov 8  }
  0x13   :  { %51 = dma.hbm_to_vmem [thread:$0]  %s3708_s6, 512, %s46_s14, [#allocation6], %s3190_s25, %s3190_s25, %s3191_s26  }
  0x14   :  { %s3116_s11 = scalar_lea.hbm %s3706_s4, 512 }
  0x15   :  { %p3117_p8 = scmp.ne.s32.totalorder %s3706_s4, %s3116_s11  ;;  %p3120_p9 = scmp.lt.u32.totalorder %s3116_s11, %s3706_s4 }
  0x17   :  { %p3122_p10 = pnand %p3120_p9, %p3117_p8 }
  0x19   :  { %3125 = shalt.err (!%p3122_p10)
}
  0x1a   :  { %s3126_s18 = scalar_lea.vmem %s3254_s16, 512  ;;  %p3131_p12 = scmp.lt.s32.totalorder %s3254_s16, %s3254_s16 }
  0x1b   :  { %p3127_p11 = scmp.ne.s32.totalorder %s3254_s16, %s3126_s18  ;;  %p3132_p13 = scmp.lt.s32.totalorder %s3126_s18, %s3126_s18 }
  0x1d   :  { %p3133_p0 = por %p3132_p13, %p3131_p12 }
  0x1f   :  { %p3134_p1 = pnand %p3133_p0, %p3127_p11 }
  0x21   :  { %3137 = shalt.err (!%p3134_p1)
}
  0x22   :  { %37 = dma.hbm_to_vmem [thread:$0]  %s3706_s4, 512, %s3254_s16, [#allocation3], %s3190_s25, %s3190_s25, %s3191_s26  }
  0x23   :  { %s3192_s19 = smov [#allocation7]   ;;  %s3138_s23 = scalar_lea.hbm %s3709_s7, 1024 }
  0x24   :  { %s57_s20 = sshll.u32 %s3192_s19, 4  ;;  %p3139_p2 = scmp.ne.s32.totalorder %s3709_s7, %s3138_s23  ;;  %s58_s20 = int_to_ptr.vmem [resolvable:$true] %s57_s20 }
  0x25   :  { %p3142_p3 = scmp.lt.u32.totalorder %s3138_s23, %s3709_s7 }
  0x27   :  { %p3144_p4 = pnand %p3142_p3, %p3139_p2 }
  0x29   :  { %3147 = shalt.err (!%p3144_p4)
}
  0x2a   :  { %s3148_s30 = scalar_lea.vmem %s58_s20, 1024  ;;  %p3153_p6 = scmp.lt.s32.totalorder %s58_s20, %s58_s20 }
  0x2b   :  { %p3149_p5 = scmp.ne.s32.totalorder %s58_s20, %s3148_s30  ;;  %p3154_p7 = scmp.lt.s32.totalorder %s3148_s30, %s3148_s30 }
  0x2d   :  { %p3155_p8 = por %p3154_p7, %p3153_p6 }
  0x2f   :  { %p3156_p9 = pnand %p3155_p8, %p3149_p5 }
  0x31   :  { %3159 = shalt.err (!%p3156_p9)
}
  0x32   :  { %63 = dma.hbm_to_vmem [thread:$0]  %s3709_s7, 1024, %s58_s20, [#allocation6], %s3190_s25, %s3190_s25, %s3191_s26  }
  0x33   :  { %3182 = dma.done.wait [#allocation3], 512  }
  0x34   :  { %3183 = vsyncadd [#allocation3], 4294966784 }
  0x35   :  { %3184 = dma.done.wait [#allocation6], 1536  }
  0x36   :  { %3185 = vsyncadd [#allocation6], 4294965760  ;;  %v3193_v0 = vmov 0.0|0.0   ;;  %v3194_v1 = vmov 0.0   ;;  %vm3195_vm0 = vmmov 0   ;;  %v86_v2 = vld [vmem:[%s3703_s1 + $0x8] sm:$0xff]  ;;  %v95_v34 = vlaneseq }
  0x37   :  { %2837 = vmatprep.subr.bf16.mxu1 %v3193_v0  ;;  %194 = vmatprep.mubr.f32.mxu0 %v3194_v1  ;;  %v88_v3 = vld [vmem:[%s3703_s1 + $0x18] sm:$0xff]  ;;  %v85_v4 = vld [vmem:[%s3703_s1] sm:$0xff]  ;;  %v87_v6 = vld [vmem:[%s3703_s1 + $0x10] sm:$0xff]  ;;  %vm105_vm1 = vcmask 261120   ;;  %vm1940_vm2 = vcmask 523264   ;;  %vm2031_vm4 = vcmask 64512  }
  0x38   :  { %2606 = vmatprep.mubr.msk.f32.mxu1 %vm3195_vm0, %v3194_v1  ;;  %v2829_v5 = vpack.c.bf16 %v88_v3, %v86_v2  ;;  %v243_v7 = vld [vmem:[%s3705_s3] sm:$0xff]  ;;  %v244_v8 = vld [vmem:[%s3705_s3 + $0x8] sm:$0xff]  ;;  %v2831_v9 = vpack.c.bf16 %v87_v6, %v85_v4  ;;  %v92_v12 = vld [vmem:[%s3703_s1 + $0x38] sm:$0xff]  ;;  %v96_v35 = vshrl.u32 %v95_v34, 7 }
  0x39   :  { %v3328_v10 = vpack.c.bf16 %v244_v8, %v243_v7  ;;  %v90_v11 = vld [vmem:[%s3703_s1 + $0x28] sm:$0xff]  ;;  %v89_v13 = vld [vmem:[%s3703_s1 + $0x20] sm:$0xff]  ;;  %v91_v15 = vld [vmem:[%s3703_s1 + $0x30] sm:$0xff] }
  0x3a   :  { %2830 = vmatprep.subr.bf16.mxu0 %v2829_v5  ;;  %v2833_v14 = vpack.c.bf16 %v92_v12, %v90_v11  ;;  %v245_v16 = vld [vmem:[%s3705_s3 + $0x10] sm:$0xff]  ;;  %v246_v17 = vld [vmem:[%s3705_s3 + $0x18] sm:$0xff]  ;;  %v2835_v18 = vpack.c.bf16 %v91_v15, %v89_v13  ;;  %v247_v20 = vld [vmem:[#allocation2] sm:$0xff]  ;;  %v3418_v36 = vsub.s32 0, %v96_v35  ;;  %v101_v38 = vsub.s32 1, %v96_v35 }
  0x3b   :  { %2832 = vmatpush1.bf16.msra.mxu0 %v2831_v9  ;;  %2839 = vmatpush3.bf16.msra.mxu1 %v3328_v10  ;;  %v3349_v19 = vpack.c.bf16 %v246_v17, %v245_v16  ;;  %v248_v21 = vld [vmem:[#allocation2 + $0x8] sm:$0xff]  ;;  %v77_v22 = vld [vmem:[%s3702_s0] sm:$0xff]  ;;  %v249_v24 = vld [vmem:[#allocation2 + $0x10] sm:$0xff] }
  0x3c   :  { %2834 = vmatprep.subr.bf16.mxu0 %v2833_v14  ;;  %2840 = vmatprep.subr.bf16.mxu1 %v3193_v0  ;;  %v3356_v23 = vpack.c.bf16 %v248_v21, %v247_v20  ;;  %v250_v25 = vld [vmem:[#allocation2 + $0x18] sm:$0xff]  ;;  %v78_v26 = vld [vmem:[%s3702_s0 + $0x8] sm:$0xff]  ;;  %v79_v28 = vld [vmem:[%s3702_s0 + $0x10] sm:$0xff] }
  0x3d   :  { %v3367_v27 = vpack.c.bf16 %v250_v25, %v249_v24  ;;  %v80_v29 = vld [vmem:[%s3702_s0 + $0x18] sm:$0xff]  ;;  %v81_v30 = vld [vmem:[%s3702_s0 + $0x20] sm:$0xff]  ;;  %v82_v31 = vld [vmem:[%s3702_s0 + $0x28] sm:$0xff] }
  0x3e   :  { %v83_v32 = vld [vmem:[%s3702_s0 + $0x30] sm:$0xff]  ;;  %v84_v33 = vld [vmem:[%s3702_s0 + $0x38] sm:$0xff]  ;;  %v93_v37 = vld [vmem:[%s3704_s2] sm:$0x3]  ;;  %s3196_s0 = smov 64   ;;  %s3197_s2 = smov 32  }
  0x3f   :  { %2836 = vmatpush1.bf16.msra.mxu0 %v2835_v18  ;;  %2842 = vmatpush3.bf16.msra.mxu1 %v3349_v19  ;;  %v98_v39 = vrot.slane %v93_v37, %v3418_v36  ;;  %v102_v40 = vrot.slane %v93_v37, %v101_v38 }
  0x40   :  { %2843 = vmatprep.subr.bf16.mxu1 %v3193_v0  ;;  %2861 = vmatprep.subr.bf16.mxu0 %v3193_v0 }
  0x42   :  { %2445 = vmatmul.mubr.msk.f32.vlgmr.msra.gmra.mrb[0].mxu0 %vm105_vm1, %v77_v22  ;;  %2607 = vmatmul.mubr.f32.vlgmr.msra.gmra.mrb[0].mxu1 %v3194_v1 }
  0x43   :  { %200 = vmatprep.mubr.f32.mxu0 %v3194_v1  ;;  %2845 = vmatpush3.bf16.msra.mxu1 %v3356_v23 }
  0x44   :  { %2846 = vmatprep.subr.bf16.mxu1 %v3193_v0  ;;  %2617 = vmatprep.mubr.msk.f32.mxu1 %vm3195_vm0, %v3194_v1 }
  0x45   :  { %2863 = vmatpush3.bf16.msra.mxu0 %v3328_v10 }
  0x46   :  { %2446 = vmatmul.mubr.msk.f32.gmra.mrb[2].mxu0 %vm105_vm1, %v78_v26  ;;  %2864 = vmatprep.subr.bf16.mxu0 %v3193_v0 }
  0x47   :  { %206 = vmatprep.mubr.f32.mxu0 %v3194_v1  ;;  %2848 = vmatpush3.bf16.msra.mxu1 %v3367_v27 }
  0x48   :  { %2849 = vmatprep.subr.bf16.mxu1 %v3193_v0 }
  0x49   :  { %2866 = vmatpush3.bf16.msra.mxu0 %v3349_v19 }
  0x4a   :  { %2447 = vmatmul.mubr.msk.f32.gmra.mrb[4].mxu0 %vm105_vm1, %v79_v28  ;;  %2618 = vmatmul.mubr.f32.vlgmr.msra.gmra.mrb[2].mxu1 %v3194_v1 }
  0x4b   :  { %212 = vmatprep.mubr.f32.mxu0 %v3194_v1  ;;  %2851 = vmatpush3.bf16.msra.mxu1 %v3328_v10 }
  0x4c   :  { %2852 = vmatprep.subr.bf16.mxu1 %v3193_v0  ;;  %2628 = vmatprep.mubr.msk.f32.mxu1 %vm3195_vm0, %v3194_v1 }
  0x4d   :  { %2873 = vmatprep.subr.bf16.mxu0 %v3193_v0 }
  0x4e   :  { %2448 = vmatmul.mubr.msk.f32.gmra.mrb[6].mxu0 %vm105_vm1, %v80_v29 }
  0x4f   :  { %218 = vmatprep.mubr.f32.mxu0 %v3194_v1  ;;  %2854 = vmatpush3.bf16.msra.mxu1 %v3349_v19 }
  0x50   :  { %2855 = vmatprep.subr.bf16.mxu1 %v3193_v0 }
  0x52   :  { %2449 = vmatmul.mubr.msk.f32.gmra.mrb[8].mxu0 %vm105_vm1, %v81_v30 }
  0x53   :  { %224 = vmatprep.mubr.f32.mxu0 %v3194_v1 }
  0x56   :  { %2450 = vmatmul.mubr.msk.f32.gmra.mrb[10].mxu0 %vm105_vm1, %v82_v31 }
  0x57   :  { %230 = vmatprep.mubr.f32.mxu0 %v3194_v1 }
  0x5a   :  { %2451 = vmatmul.mubr.msk.f32.gmra.mrb[12].mxu0 %vm105_vm1, %v83_v32 }
  0x5b   :  { %236 = vmatprep.mubr.f32.mxu0 %v3194_v1 }
  0x5e   :  { %2452 = vmatmul.mubr.msk.f32.gmra.mrb[14].mxu0 %vm105_vm1, %v84_v33 }
  0x5f   :  { %2650 = vmatprep.mubr.msk.f32.mxu0 %vm3195_vm0, %v3194_v1 }
 0x115   :  { %v196_v41 = vpop.f32.mrb[0].mxu0  ;;  %v320_v42 = vpop.f32.mrb[0].mxu1 }
 0x116   :  { %v197_v43 = vadd.f32 %v196_v41, %v98_v39  ;;  %v198_v44 = vpop.f32.mrb[1].mxu0  ;;  %v2608_v45 = vpop.f32.mrb[1].mxu1 }
 0x117   :  { %v3424_v46 = vadd.f32 %v198_v44, %v102_v40 }
 0x118   :  { %v324_v47 = vadd.f32 %v320_v42, %v197_v43 }
 0x119   :  { %v202_v48 = vpop.f32.mrb[2].mxu0 }
 0x11a   :  { %2962 = vtanh.f32 %v324_v47  ;;  %v3426_v49 = vadd.f32 %v202_v48, %v98_v39  ;;  %v204_v50 = vpop.f32.mrb[3].mxu0  ;;  %v2453_v20 = vmul.f32 -1.442695, %v324_v47 }
 0x11b   :  { %v3428_v51 = vadd.f32 %v204_v50, %v102_v40 }
 0x11c   :  { %2964 = vpow2.f32 %v2453_v20 }
 0x11d   :  { %v208_v52 = vpop.f32.mrb[4].mxu0  ;;  %v415_v53 = vpop.f32.mrb[2].mxu1 }
 0x11e   :  { %v3430_v54 = vadd.f32 %v208_v52, %v98_v39  ;;  %v210_v55 = vpop.f32.mrb[5].mxu0  ;;  %v2619_v56 = vpop.f32.mrb[3].mxu1 }
 0x11f   :  { %v3432_v57 = vadd.f32 %v210_v55, %v102_v40 }
 0x121   :  { %v214_v58 = vpop.f32.mrb[6].mxu0 }
 0x122   :  { %v3434_v59 = vadd.f32 %v214_v58, %v98_v39  ;;  %v216_v60 = vpop.f32.mrb[7].mxu0 }
 0x123   :  { %v3436_v61 = vadd.f32 %v216_v60, %v102_v40 }
 0x124   :  { %v2963_v62 = vpop.eup %2962 }
 0x125   :  { %334 = vrot.lane.b32.xlu0 %v2963_v62, %s3196_s0  ;;  %v220_v63 = vpop.f32.mrb[8].mxu0 }
 0x126   :  { %v3439_v2 = vadd.f32 %v220_v63, %v98_v39  ;;  %v222_v3 = vpop.f32.mrb[9].mxu0  ;;  %v2965_v21 = vpop.eup %2964 }
 0x127   :  { %v3441_v4 = vadd.f32 %v222_v3, %v102_v40  ;;  %v328_v22 = vadd.f32 1.0, %v2965_v21 }
 0x129   :  { %v226_v5 = vpop.f32.mrb[10].mxu0  ;;  %2966 = vrcp.f32 %v328_v22 }
 0x12a   :  { %v3443_v6 = vadd.f32 %v226_v5, %v98_v39  ;;  %v228_v7 = vpop.f32.mrb[11].mxu0 }
 0x12b   :  { %v3445_v8 = vadd.f32 %v228_v7, %v102_v40 }
 0x12d   :  { %v232_v9 = vpop.f32.mrb[12].mxu0 }
 0x12e   :  { %v3447_v11 = vadd.f32 %v232_v9, %v98_v39  ;;  %v234_v12 = vpop.f32.mrb[13].mxu0 }
 0x12f   :  { %v3449_v13 = vadd.f32 %v234_v12, %v102_v40 }
 0x131   :  { %v238_v14 = vpop.f32.mrb[14].mxu0 }
 0x132   :  { %v3451_v15 = vadd.f32 %v238_v14, %v98_v39  ;;  %v240_v16 = vpop.f32.mrb[15].mxu0 }
 0x133   :  { %v241_v17 = vadd.f32 %v240_v16, %v102_v40  ;;  %v2967_v24 = vpop.eup %2966 }
 0x134   :  { %v332_v29 = vmul.f32 0.0, %v2967_v24 }
 0x135   :  { %v419_v18 = vadd.f32 %v415_v53, %v241_v17 }
 0x137   :  { %2968 = vtanh.f32 %v419_v18  ;;  %v2454_v33 = vmul.f32 -1.442695, %v419_v18 }
 0x141   :  { %v2969_v28 = vpop.eup %2968 }
 0x197   :  { %v335_v25 = vpop.permute.xlu0 %334 }
 0x198   :  { %v337_v26 = vmul.f32 %v2967_v24, %v335_v25 }
 0x19a   :  { %339 = vrot.lane.b32.xlu0 %v337_v26, %s3197_s2 }
 0x19e   :  { %429 = vrot.lane.b32.xlu0 %v2969_v28, %s3196_s0 }
 0x20c   :  { %v340_v30 = vpop.permute.xlu0 %339 }
 0x20d   :  { %v342_v31 = vadd.f32 %v340_v30, %v332_v29 }
 0x20f   :  { %2970 = vtanh.f32 %v342_v31 }
 0x210   :  { %2972 = vpow2.f32 %v2454_v33  ;;  %v430_v40 = vpop.permute.xlu0 %429 }
 0x219   :  { %v2971_v32 = vpop.eup %2970 }
 0x21a   :  { %345 = vrot.lane.b32.xlu1 %v2971_v32, %s3196_s0  ;;  %v2973_v34 = vpop.eup %2972 }
 0x21b   :  { %v423_v35 = vadd.f32 1.0, %v2973_v34 }
 0x21d   :  { %2974 = vrcp.f32 %v423_v35 }
 0x227   :  { %v2975_v39 = vpop.eup %2974 }
 0x228   :  { %v432_v41 = vmul.f32 %v2975_v39, %v430_v40  ;;  %v427_v43 = vmul.f32 0.0, %v2975_v39 }
 0x28c   :  { %v346_v37 = vpop.permute.xlu1 %345 }
 0x28d   :  { %v348_v38 = vmul.f32 %v2967_v24, %v346_v37 }
 0x28f   :  { %445 = vrot.lane.b32.xlu1 %v348_v38, %s3197_s2 }
 0x293   :  { %434 = vrot.lane.b32.xlu1 %v432_v41, %s3197_s2 }
 0x301   :  { %v446_v42 = vpop.permute.xlu1 %445 }
 0x302   :  { %2629 = vmatmul.mubr.msk.f32.vlgmr.msra.gmra.mrb[4].mxu1 %vm105_vm1, %v446_v42 }
 0x303   :  { %2857 = vmatpush3.bf16.msra.mxu1 %v3356_v23  ;;  %2639 = vmatprep.mubr.msk.f32.mxu1 %vm3195_vm0, %v3194_v1 }
 0x304   :  { %2858 = vmatprep.subr.bf16.mxu1 %v3193_v0 }
 0x305   :  { %v435_v44 = vpop.permute.xlu1 %434 }
 0x306   :  { %v437_v45 = vadd.f32 %v435_v44, %v427_v43 }
 0x307   :  { %2860 = vmatpush3.bf16.msra.mxu1 %v3367_v27 }
 0x308   :  { %2976 = vtanh.f32 %v437_v45  ;;  %2867 = vmatprep.subr.bf16.mxu1 %v3193_v0 }
 0x312   :  { %v2977_v47 = vpop.eup %2976 }
 0x313   :  { %440 = vrot.lane.b32.xlu0 %v2977_v47, %s3196_s0 }
 0x385   :  { %v441_v48 = vpop.permute.xlu0 %440 }
 0x386   :  { %v443_v50 = vmul.f32 %v2975_v39, %v441_v48 }
 0x388   :  { %545 = vrot.lane.b32.xlu1 %v443_v50, %s3197_s2 }
 0x3d5   :  { %v515_v52 = vpop.f32.mrb[4].mxu1 }
 0x3d6   :  { %v519_v53 = vadd.f32 %v515_v52, %v3426_v49  ;;  %v2630_v55 = vpop.f32.mrb[5].mxu1 }
 0x3d8   :  { %2978 = vtanh.f32 %v519_v53  ;;  %v2456_v49 = vmul.f32 -1.442695, %v519_v53 }
 0x3da   :  { %2980 = vpow2.f32 %v2456_v49 }
 0x3e2   :  { %v2979_v56 = vpop.eup %2978 }
 0x3e3   :  { %529 = vrot.lane.b32.xlu0 %v2979_v56, %s3196_s0 }
 0x3e4   :  { %v2981_v60 = vpop.eup %2980 }
 0x3e5   :  { %v523_v62 = vadd.f32 1.0, %v2981_v60 }
 0x3e7   :  { %2982 = vrcp.f32 %v523_v62 }
 0x3f1   :  { %v2983_v63 = vpop.eup %2982 }
 0x3f2   :  { %v527_v7 = vmul.f32 %v2983_v63, %v342_v31 }
 0x3fa   :  { %v546_v58 = vpop.permute.xlu1 %545 }
 0x3fb   :  { %2640 = vmatmul.mubr.msk.f32.vlgmr.msra.gmra.mrb[6].mxu1 %vm105_vm1, %v546_v58 }
 0x3fc   :  { %2869 = vmatpush3.bf16.msra.mxu1 %v3356_v23  ;;  %2661 = vmatprep.mubr.msk.f32.mxu1 %vm3195_vm0, %v3194_v1 }
 0x3fd   :  { %2870 = vmatprep.subr.bf16.mxu1 %v3193_v0 }
 0x400   :  { %2872 = vmatpush3.bf16.msra.mxu1 %v3367_v27 }
 0x401   :  { %2879 = vmatprep.subr.bf16.mxu1 %v3193_v0 }
 0x455   :  { %v530_v3 = vpop.permute.xlu0 %529 }
 0x456   :  { %v532_v5 = vmul.f32 %v2983_v63, %v530_v3 }
 0x458   :  { %534 = vrot.lane.b32.xlu1 %v532_v5, %s3197_s2 }
 0x4ca   :  { %v535_v9 = vpop.permute.xlu1 %534 }
 0x4cb   :  { %v537_v12 = vadd.f32 %v535_v9, %v527_v7 }
 0x4cd   :  { %2984 = vtanh.f32 %v537_v12 }
 0x4ce   :  { %v615_v14 = vpop.f32.mrb[6].mxu1 }
 0x4cf   :  { %v619_v16 = vadd.f32 %v615_v14, %v3449_v13  ;;  %v2641_v17 = vpop.f32.mrb[7].mxu1 }
 0x4d1   :  { %2986 = vtanh.f32 %v619_v16  ;;  %v2458_v21 = vmul.f32 -1.442695, %v619_v16 }
 0x4d3   :  { %2988 = vpow2.f32 %v2458_v21 }
 0x4d7   :  { %v2985_v18 = vpop.eup %2984 }
 0x4d8   :  { %540 = vrot.lane.b32.xlu0 %v2985_v18, %s3196_s0 }
 0x4db   :  { %v2987_v20 = vpop.eup %2986 }
 0x4dc   :  { %629 = vrot.lane.b32.xlu0 %v2987_v20, %s3196_s0 }
 0x4dd   :  { %v2989_v22 = vpop.eup %2988 }
 0x4de   :  { %v623_v24 = vadd.f32 1.0, %v2989_v22 }
 0x4e0   :  { %2990 = vrcp.f32 %v623_v24 }
 0x4ea   :  { %v2991_v28 = vpop.eup %2990 }
 0x4eb   :  { %v627_v31 = vmul.f32 %v2991_v28, %v437_v45 }
 0x54a   :  { %v541_v25 = vpop.permute.xlu0 %540 }
 0x54b   :  { %v543_v26 = vmul.f32 %v2983_v63, %v541_v25 }
 0x54d   :  { %645 = vrot.lane.b32.xlu1 %v543_v26, %s3197_s2 }
 0x54e   :  { %v630_v29 = vpop.permute.xlu0 %629 }
 0x54f   :  { %v632_v13 = vmul.f32 %v2991_v28, %v630_v29 }
 0x551   :  { %634 = vrot.lane.b32.xlu1 %v632_v13, %s3197_s2 }
 0x5bf   :  { %v646_v30 = vpop.permute.xlu1 %645 }
 0x5c0   :  { %2651 = vmatmul.mubr.msk.f32.vlgmr.msra.gmra.mrb[16].mxu0 %vm105_vm1, %v646_v30 }
 0x5c1   :  { %2875 = vmatpush3.bf16.msra.mxu0 %v3328_v10  ;;  %2672 = vmatprep.mubr.msk.f32.mxu0 %vm3195_vm0, %v3194_v1 }
 0x5c2   :  { %2876 = vmatprep.subr.bf16.mxu0 %v3193_v0 }
 0x5c3   :  { %v635_v32 = vpop.permute.xlu1 %634 }
 0x5c4   :  { %v637_v33 = vadd.f32 %v635_v32, %v627_v31 }
 0x5c5   :  { %2878 = vmatpush3.bf16.msra.mxu0 %v3349_v19 }
 0x5c6   :  { %2992 = vtanh.f32 %v637_v33  ;;  %2885 = vmatprep.subr.bf16.mxu0 %v3193_v0 }
 0x5d0   :  { %v2993_v34 = vpop.eup %2992 }
 0x5d1   :  { %640 = vrot.lane.b32.xlu0 %v2993_v34, %s3196_s0 }
 0x643   :  { %v641_v35 = vpop.permute.xlu0 %640 }
 0x644   :  { %v643_v37 = vmul.f32 %v2991_v28, %v641_v35 }
 0x646   :  { %745 = vrot.lane.b32.xlu1 %v643_v37, %s3197_s2 }
 0x693   :  { %v715_v38 = vpop.f32.mrb[16].mxu0 }
 0x694   :  { %v719_v39 = vadd.f32 %v715_v38, %v3430_v54  ;;  %v2652_v40 = vpop.f32.mrb[17].mxu0 }
 0x696   :  { %2994 = vtanh.f32 %v719_v39  ;;  %v2460_v54 = vmul.f32 -1.442695, %v719_v39 }
 0x698   :  { %2996 = vpow2.f32 %v2460_v54 }
 0x6a0   :  { %v2995_v41 = vpop.eup %2994 }
 0x6a1   :  { %729 = vrot.lane.b32.xlu0 %v2995_v41, %s3196_s0 }
 0x6a2   :  { %v2997_v43 = vpop.eup %2996 }
 0x6a3   :  { %v723_v44 = vadd.f32 1.0, %v2997_v43 }
 0x6a5   :  { %2998 = vrcp.f32 %v723_v44 }
 0x6af   :  { %v2999_v45 = vpop.eup %2998 }
 0x6b0   :  { %v727_v50 = vmul.f32 %v2999_v45, %v537_v12 }
 0x6b8   :  { %v746_v42 = vpop.permute.xlu1 %745 }
 0x6b9   :  { %2662 = vmatmul.mubr.msk.f32.vlgmr.msra.gmra.mrb[8].mxu1 %vm105_vm1, %v746_v42 }
 0x6ba   :  { %2881 = vmatpush3.bf16.msra.mxu1 %v3356_v23  ;;  %2683 = vmatprep.mubr.msk.f32.mxu1 %vm3195_vm0, %v3194_v1 }
 0x6bb   :  { %2882 = vmatprep.subr.bf16.mxu1 %v3193_v0 }
 0x6be   :  { %2884 = vmatpush3.bf16.msra.mxu1 %v3367_v27 }
 0x6bf   :  { %2891 = vmatprep.subr.bf16.mxu1 %v3193_v0 }
 0x713   :  { %v730_v47 = vpop.permute.xlu0 %729 }
 0x714   :  { %v732_v48 = vmul.f32 %v2999_v45, %v730_v47 }
 0x716   :  { %734 = vrot.lane.b32.xlu1 %v732_v48, %s3197_s2 }
 0x788   :  { %v735_v52 = vpop.permute.xlu1 %734 }
 0x789   :  { %v737_v53 = vadd.f32 %v735_v52, %v727_v50 }
 0x78b   :  { %3000 = vtanh.f32 %v737_v53 }
 0x78c   :  { %v815_v55 = vpop.f32.mrb[8].mxu1 }
 0x78d   :  { %v819_v56 = vadd.f32 %v815_v55, %v3445_v8  ;;  %v2663_v58 = vpop.f32.mrb[9].mxu1 }
 0x78f   :  { %3002 = vtanh.f32 %v819_v56  ;;  %v2462_v62 = vmul.f32 -1.442695, %v819_v56 }
 0x791   :  { %3004 = vpow2.f32 %v2462_v62 }
 0x795   :  { %v3001_v49 = vpop.eup %3000 }
 0x796   :  { %740 = vrot.lane.b32.xlu0 %v3001_v49, %s3196_s0 }
 0x799   :  { %v3003_v60 = vpop.eup %3002 }
 0x79a   :  { %829 = vrot.lane.b32.xlu0 %v3003_v60, %s3196_s0 }
 0x79b   :  { %v3005_v63 = vpop.eup %3004 }
 0x79c   :  { %v823_v3 = vadd.f32 1.0, %v3005_v63 }
 0x79e   :  { %3006 = vrcp.f32 %v823_v3 }
 0x7a8   :  { %v3007_v9 = vpop.eup %3006 }
 0x7a9   :  { %v827_v16 = vmul.f32 %v3007_v9, %v637_v33 }
 0x808   :  { %v741_v5 = vpop.permute.xlu0 %740 }
 0x809   :  { %v743_v7 = vmul.f32 %v2999_v45, %v741_v5 }
 0x80b   :  { %845 = vrot.lane.b32.xlu1 %v743_v7, %s3197_s2 }
 0x80c   :  { %v830_v12 = vpop.permute.xlu0 %829 }
 0x80d   :  { %v832_v8 = vmul.f32 %v3007_v9, %v830_v12 }
 0x80f   :  { %834 = vrot.lane.b32.xlu1 %v832_v8, %s3197_s2 }
 0x87d   :  { %v846_v14 = vpop.permute.xlu1 %845 }
 0x87e   :  { %2673 = vmatmul.mubr.msk.f32.vlgmr.msra.gmra.mrb[18].mxu0 %vm105_vm1, %v846_v14 }
 0x87f   :  { %2887 = vmatpush3.bf16.msra.mxu0 %v3328_v10  ;;  %2694 = vmatprep.mubr.msk.f32.mxu0 %vm3195_vm0, %v3194_v1 }
 0x880   :  { %2888 = vmatprep.subr.bf16.mxu0 %v3193_v0 }
 0x881   :  { %v835_v17 = vpop.permute.xlu1 %834 }
 0x882   :  { %v837_v18 = vadd.f32 %v835_v17, %v827_v16 }
 0x883   :  { %2890 = vmatpush3.bf16.msra.mxu0 %v3349_v19 }
 0x884   :  { %3008 = vtanh.f32 %v837_v18  ;;  %2897 = vmatprep.subr.bf16.mxu0 %v3193_v0 }
 0x88e   :  { %v3009_v20 = vpop.eup %3008 }
 0x88f   :  { %840 = vrot.lane.b32.xlu0 %v3009_v20, %s3196_s0 }
 0x901   :  { %v841_v21 = vpop.permute.xlu0 %840 }
 0x902   :  { %v843_v22 = vmul.f32 %v3007_v9, %v841_v21 }
 0x904   :  { %945 = vrot.lane.b32.xlu1 %v843_v22, %s3197_s2 }
 0x951   :  { %v915_v24 = vpop.f32.mrb[18].mxu0 }
 0x952   :  { %v919_v25 = vadd.f32 %v915_v24, %v3434_v59  ;;  %v2674_v26 = vpop.f32.mrb[19].mxu0 }
 0x954   :  { %3010 = vtanh.f32 %v919_v25  ;;  %v2464_v59 = vmul.f32 -1.442695, %v919_v25 }
 0x956   :  { %3012 = vpow2.f32 %v2464_v59 }
 0x95e   :  { %v3011_v28 = vpop.eup %3010 }
 0x95f   :  { %929 = vrot.lane.b32.xlu0 %v3011_v28, %s3196_s0 }
 0x960   :  { %v3013_v13 = vpop.eup %3012 }
 0x961   :  { %v923_v30 = vadd.f32 1.0, %v3013_v13 }
 0x963   :  { %3014 = vrcp.f32 %v923_v30 }
 0x96d   :  { %v3015_v31 = vpop.eup %3014 }
 0x96e   :  { %v927_v34 = vmul.f32 %v3015_v31, %v737_v53 }
 0x976   :  { %v946_v29 = vpop.permute.xlu1 %945 }
 0x977   :  { %2684 = vmatmul.mubr.msk.f32.vlgmr.msra.gmra.mrb[10].mxu1 %vm105_vm1, %v946_v29 }
 0x978   :  { %2893 = vmatpush3.bf16.msra.mxu1 %v3356_v23  ;;  %2705 = vmatprep.mubr.msk.f32.mxu1 %vm3195_vm0, %v3194_v1 }
 0x979   :  { %2894 = vmatprep.subr.bf16.mxu1 %v3193_v0 }
 0x97c   :  { %2896 = vmatpush3.bf16.msra.mxu1 %v3367_v27 }
 0x97d   :  { %2903 = vmatprep.subr.bf16.mxu1 %v3193_v0 }
 0x9d1   :  { %v930_v32 = vpop.permute.xlu0 %929 }
 0x9d2   :  { %v932_v33 = vmul.f32 %v3015_v31, %v930_v32 }
 0x9d4   :  { %934 = vrot.lane.b32.xlu1 %v932_v33, %s3197_s2 }
 0xa46   :  { %v935_v35 = vpop.permute.xlu1 %934 }
 0xa47   :  { %v937_v37 = vadd.f32 %v935_v35, %v927_v34 }
 0xa49   :  { %3016 = vtanh.f32 %v937_v37 }
 0xa4a   :  { %v1015_v38 = vpop.f32.mrb[10].mxu1 }
 0xa4b   :  { %v1019_v39 = vadd.f32 %v1015_v38, %v3441_v4  ;;  %v2685_v40 = vpop.f32.mrb[11].mxu1 }
 0xa4d   :  { %3018 = vtanh.f32 %v1019_v39  ;;  %v2466_v54 = vmul.f32 -1.442695, %v1019_v39 }
 0xa4f   :  { %3020 = vpow2.f32 %v2466_v54 }
 0xa53   :  { %v3017_v41 = vpop.eup %3016 }
 0xa54   :  { %940 = vrot.lane.b32.xlu0 %v3017_v41, %s3196_s0 }
 0xa57   :  { %v3019_v42 = vpop.eup %3018 }
 0xa58   :  { %1029 = vrot.lane.b32.xlu0 %v3019_v42, %s3196_s0 }
 0xa59   :  { %v3021_v43 = vpop.eup %3020 }
 0xa5a   :  { %v1023_v44 = vadd.f32 1.0, %v3021_v43 }
 0xa5c   :  { %3022 = vrcp.f32 %v1023_v44 }
 0xa66   :  { %v3023_v48 = vpop.eup %3022 }
 0xa67   :  { %v1027_v53 = vmul.f32 %v3023_v48, %v837_v18 }
 0xac6   :  { %v941_v45 = vpop.permute.xlu0 %940 }
 0xac7   :  { %v943_v47 = vmul.f32 %v3015_v31, %v941_v45 }
 0xac9   :  { %1045 = vrot.lane.b32.xlu1 %v943_v47, %s3197_s2 }
 0xaca   :  { %v1030_v50 = vpop.permute.xlu0 %1029 }
 0xacb   :  { %v1032_v4 = vmul.f32 %v3023_v48, %v1030_v50 }
 0xacd   :  { %1034 = vrot.lane.b32.xlu1 %v1032_v4, %s3197_s2 }
 0xb3b   :  { %v1046_v52 = vpop.permute.xlu1 %1045 }
 0xb3c   :  { %2695 = vmatmul.mubr.msk.f32.vlgmr.msra.gmra.mrb[20].mxu0 %vm105_vm1, %v1046_v52 }
 0xb3d   :  { %2899 = vmatpush3.bf16.msra.mxu0 %v3328_v10  ;;  %2716 = vmatprep.mubr.msk.f32.mxu0 %vm3195_vm0, %v3194_v1 }
 0xb3e   :  { %2900 = vmatprep.subr.bf16.mxu0 %v3193_v0 }
 0xb3f   :  { %v1035_v55 = vpop.permute.xlu1 %1034 }
 0xb40   :  { %v1037_v56 = vadd.f32 %v1035_v55, %v1027_v53 }
 0xb41   :  { %2902 = vmatpush3.bf16.msra.mxu0 %v3349_v19 }
 0xb42   :  { %3024 = vtanh.f32 %v1037_v56  ;;  %2909 = vmatprep.subr.bf16.mxu0 %v3193_v0 }
 0xb4c   :  { %v3025_v58 = vpop.eup %3024 }
 0xb4d   :  { %1040 = vrot.lane.b32.xlu0 %v3025_v58, %s3196_s0 }
 0xbbf   :  { %v1041_v49 = vpop.permute.xlu0 %1040 }
 0xbc0   :  { %v1043_v60 = vmul.f32 %v3023_v48, %v1041_v49 }
 0xbc2   :  { %1145 = vrot.lane.b32.xlu1 %v1043_v60, %s3197_s2 }
 0xc0f   :  { %v1115_v62 = vpop.f32.mrb[20].mxu0 }
 0xc10   :  { %v1119_v63 = vadd.f32 %v1115_v62, %v3439_v2  ;;  %v2696_v3 = vpop.f32.mrb[21].mxu0 }
 0xc12   :  { %3026 = vtanh.f32 %v1119_v63  ;;  %v2468_v2 = vmul.f32 -1.442695, %v1119_v63 }
 0xc14   :  { %3028 = vpow2.f32 %v2468_v2 }
 0xc1c   :  { %v3027_v5 = vpop.eup %3026 }
 0xc1d   :  { %1129 = vrot.lane.b32.xlu0 %v3027_v5, %s3196_s0 }
 0xc1e   :  { %v3029_v9 = vpop.eup %3028 }
 0xc1f   :  { %v1123_v12 = vadd.f32 1.0, %v3029_v9 }
 0xc21   :  { %3030 = vrcp.f32 %v1123_v12 }
 0xc2b   :  { %v3031_v8 = vpop.eup %3030 }
 0xc2c   :  { %v1127_v17 = vmul.f32 %v3031_v8, %v937_v37 }
 0xc34   :  { %v1146_v7 = vpop.permute.xlu1 %1145 }
 0xc35   :  { %2706 = vmatmul.mubr.msk.f32.vlgmr.msra.gmra.mrb[12].mxu1 %vm105_vm1, %v1146_v7 }
 0xc36   :  { %2905 = vmatpush3.bf16.msra.mxu1 %v3356_v23  ;;  %2727 = vmatprep.mubr.msk.f32.mxu1 %vm3195_vm0, %v3194_v1 }
 0xc37   :  { %2906 = vmatprep.subr.bf16.mxu1 %v3193_v0 }
 0xc3a   :  { %2908 = vmatpush3.bf16.msra.mxu1 %v3367_v27 }
 0xc3b   :  { %2915 = vmatprep.subr.bf16.mxu1 %v3193_v0 }
 0xc8f   :  { %v1130_v14 = vpop.permute.xlu0 %1129 }
 0xc90   :  { %v1132_v16 = vmul.f32 %v3031_v8, %v1130_v14 }
 0xc92   :  { %1134 = vrot.lane.b32.xlu1 %v1132_v16, %s3197_s2 }
 0xd04   :  { %v1135_v18 = vpop.permute.xlu1 %1134 }
 0xd05   :  { %v1137_v20 = vadd.f32 %v1135_v18, %v1127_v17 }
 0xd07   :  { %3032 = vtanh.f32 %v1137_v20 }
 0xd08   :  { %v1215_v21 = vpop.f32.mrb[12].mxu1 }
 0xd09   :  { %v1219_v22 = vadd.f32 %v1215_v21, %v3436_v61  ;;  %v2707_v24 = vpop.f32.mrb[13].mxu1 }
 0xd0b   :  { %3034 = vtanh.f32 %v1219_v22  ;;  %v2470_v28 = vmul.f32 -1.442695, %v1219_v22 }
 0xd0d   :  { %3036 = vpow2.f32 %v2470_v28 }
 0xd11   :  { %v3033_v25 = vpop.eup %3032 }
 0xd12   :  { %1140 = vrot.lane.b32.xlu0 %v3033_v25, %s3196_s0 }
 0xd15   :  { %v3035_v26 = vpop.eup %3034 }
 0xd16   :  { %1229 = vrot.lane.b32.xlu0 %v3035_v26, %s3196_s0 }
 0xd17   :  { %v3037_v29 = vpop.eup %3036 }
 0xd18   :  { %v1223_v59 = vadd.f32 1.0, %v3037_v29 }
 0xd1a   :  { %3038 = vrcp.f32 %v1223_v59 }
 0xd24   :  { %v3039_v31 = vpop.eup %3038 }
 0xd25   :  { %v1227_v34 = vmul.f32 %v3039_v31, %v1037_v56 }
 0xd84   :  { %v1141_v13 = vpop.permute.xlu0 %1140 }
 0xd85   :  { %v1143_v30 = vmul.f32 %v3031_v8, %v1141_v13 }
 0xd87   :  { %1245 = vrot.lane.b32.xlu1 %v1143_v30, %s3197_s2 }
 0xd88   :  { %v1230_v32 = vpop.permute.xlu0 %1229 }
 0xd89   :  { %v1232_v61 = vmul.f32 %v3039_v31, %v1230_v32 }
 0xd8b   :  { %1234 = vrot.lane.b32.xlu1 %v1232_v61, %s3197_s2 }
 0xdf9   :  { %v1246_v33 = vpop.permute.xlu1 %1245 }
 0xdfa   :  { %2717 = vmatmul.mubr.msk.f32.vlgmr.msra.gmra.mrb[22].mxu0 %vm105_vm1, %v1246_v33 }
 0xdfb   :  { %2911 = vmatpush3.bf16.msra.mxu0 %v3328_v10  ;;  %2738 = vmatprep.mubr.msk.f32.mxu0 %vm3195_vm0, %v3194_v1 }
 0xdfc   :  { %2912 = vmatprep.subr.bf16.mxu0 %v3193_v0 }
 0xdfd   :  { %v1235_v35 = vpop.permute.xlu1 %1234 }
 0xdfe   :  { %v1237_v37 = vadd.f32 %v1235_v35, %v1227_v34 }
 0xdff   :  { %2914 = vmatpush3.bf16.msra.mxu0 %v3349_v19 }
 0xe00   :  { %3040 = vtanh.f32 %v1237_v37  ;;  %2921 = vmatprep.subr.bf16.mxu0 %v3193_v0 }
 0xe0a   :  { %v3041_v38 = vpop.eup %3040 }
 0xe0b   :  { %1240 = vrot.lane.b32.xlu0 %v3041_v38, %s3196_s0 }
 0xe7d   :  { %v1241_v39 = vpop.permute.xlu0 %1240 }
 0xe7e   :  { %v1243_v40 = vmul.f32 %v3039_v31, %v1241_v39 }
 0xe80   :  { %1345 = vrot.lane.b32.xlu1 %v1243_v40, %s3197_s2 }
 0xecd   :  { %v1315_v41 = vpop.f32.mrb[22].mxu0 }
 0xece   :  { %v1319_v42 = vadd.f32 %v1315_v41, %v3443_v6  ;;  %v2718_v54 = vpop.f32.mrb[23].mxu0 }
 0xecf   :  { %v1856_v54 = vld [vmem:[#allocation5] sm:$0xff] }
 0xed0   :  { %3042 = vtanh.f32 %v1319_v42  ;;  %v2472_v6 = vmul.f32 -1.442695, %v1319_v42 }
 0xed2   :  { %3044 = vpow2.f32 %v2472_v6  ;;  %v1858_v6 = vld [vmem:[#allocation5 + $0x10] sm:$0xff] }
 0xeda   :  { %v3043_v43 = vpop.eup %3042 }
 0xedb   :  { %1329 = vrot.lane.b32.xlu0 %v3043_v43, %s3196_s0  ;;  %v1857_v43 = vld [vmem:[#allocation5 + $0x8] sm:$0xff] }
 0xedc   :  { %v3045_v45 = vpop.eup %3044 }
 0xedd   :  { %v1323_v47 = vadd.f32 1.0, %v3045_v45  ;;  %v1859_v45 = vld [vmem:[#allocation5 + $0x18] sm:$0xff] }
 0xedf   :  { %3046 = vrcp.f32 %v1323_v47 }
 0xee9   :  { %v3047_v48 = vpop.eup %3046 }
 0xeea   :  { %v1327_v52 = vmul.f32 %v3047_v48, %v1137_v20 }
 0xef2   :  { %v1346_v44 = vpop.permute.xlu1 %1345 }
 0xef3   :  { %2728 = vmatmul.mubr.msk.f32.vlgmr.msra.gmra.mrb[14].mxu1 %vm105_vm1, %v1346_v44  ;;  %v2934_v44 = vpack.c.bf16 %v1857_v43, %v1856_v54 }
 0xef4   :  { %2917 = vmatpush3.bf16.msra.mxu1 %v3356_v23  ;;  %2749 = vmatprep.mubr.msk.f32.mxu1 %vm3195_vm0, %v3194_v1 }
 0xef5   :  { %2918 = vmatprep.subr.bf16.mxu1 %v3193_v0 }
 0xef8   :  { %2920 = vmatpush3.bf16.msra.mxu1 %v3367_v27 }
 0xef9   :  { %2927 = vmatprep.subr.bf16.mxu1 %v3193_v0 }
 0xf4d   :  { %v1330_v50 = vpop.permute.xlu0 %1329 }
 0xf4e   :  { %v1332_v4 = vmul.f32 %v3047_v48, %v1330_v50 }
 0xf50   :  { %1334 = vrot.lane.b32.xlu1 %v1332_v4, %s3197_s2 }
 0xfc2   :  { %v1335_v53 = vpop.permute.xlu1 %1334 }
 0xfc3   :  { %v1337_v55 = vadd.f32 %v1335_v53, %v1327_v52  ;;  %v1855_v53 = vld [vmem:[%s3707_s5] sm:$0xff] }
 0xfc5   :  { %3048 = vtanh.f32 %v1337_v55 }
 0xfc6   :  { %v1415_v56 = vpop.f32.mrb[14].mxu1 }
 0xfc7   :  { %v1419_v58 = vadd.f32 %v1415_v56, %v3432_v57  ;;  %v2729_v49 = vpop.f32.mrb[15].mxu1  ;;  %v3627_v56 = vld [vmem:[%s3710_s8] ss:$0 sm:$0xff] }
 0xfc9   :  { %3050 = vtanh.f32 %v1419_v58  ;;  %v2474_v63 = vmul.f32 -1.442695, %v1419_v58 }
 0xfcb   :  { %3052 = vpow2.f32 %v2474_v63 }
 0xfcf   :  { %v3049_v60 = vpop.eup %3048 }
 0xfd0   :  { %1340 = vrot.lane.b32.xlu0 %v3049_v60, %s3196_s0 }
 0xfd3   :  { %v3051_v62 = vpop.eup %3050 }
 0xfd4   :  { %1429 = vrot.lane.b32.xlu0 %v3051_v62, %s3196_s0 }
 0xfd5   :  { %v3053_v3 = vpop.eup %3052 }
 0xfd6   :  { %v1423_v5 = vadd.f32 1.0, %v3053_v3 }
 0xfd8   :  { %3054 = vrcp.f32 %v1423_v5 }
 0xfe2   :  { %v3055_v9 = vpop.eup %3054 }
 0xfe3   :  { %v1427_v14 = vmul.f32 %v3055_v9, %v1237_v37 }
0x1042   :  { %v1341_v7 = vpop.permute.xlu0 %1340 }
0x1043   :  { %v1343_v2 = vmul.f32 %v3047_v48, %v1341_v7  ;;  %v2937_v48 = vpack.c.bf16 %v1859_v45, %v1858_v6 }
0x1045   :  { %1445 = vrot.lane.b32.xlu1 %v1343_v2, %s3197_s2 }
0x1046   :  { %v1430_v12 = vpop.permute.xlu0 %1429 }
0x1047   :  { %v1432_v57 = vmul.f32 %v3055_v9, %v1430_v12 }
0x1049   :  { %1434 = vrot.lane.b32.xlu1 %v1432_v57, %s3197_s2 }
0x10b7   :  { %v1446_v8 = vpop.permute.xlu1 %1445 }
0x10b8   :  { %2739 = vmatmul.mubr.msk.f32.vlgmr.msra.gmra.mrb[24].mxu0 %vm105_vm1, %v1446_v8 }
0x10b9   :  { %2923 = vmatpush3.bf16.msra.mxu0 %v3328_v10  ;;  %2760 = vmatprep.mubr.msk.f32.mxu0 %vm3195_vm0, %v3194_v1 }
0x10ba   :  { %2924 = vmatprep.subr.bf16.mxu0 %v3193_v0 }
0x10bb   :  { %v1435_v16 = vpop.permute.xlu1 %1434 }
0x10bc   :  { %v3583_v17 = vadd.f32 %v1435_v16, %v1427_v14  ;;  %v2108_v14 = vld [vmem:[#allocation7] sm:$0xff]  ;;  %v2109_v16 = vld [vmem:[#allocation7 + $0x8] sm:$0xff] }
0x10bd   :  { %2926 = vmatpush3.bf16.msra.mxu0 %v3349_v19 }
0x10be   :  { %3056 = vtanh.f32 %v3583_v17  ;;  %2933 = vmatprep.subr.bf16.mxu0 %v3193_v0 }
0x10c8   :  { %v3057_v18 = vpop.eup %3056 }
0x10c9   :  { %1440 = vrot.lane.b32.xlu0 %v3057_v18, %s3196_s0  ;;  %v2940_v18 = vpack.c.bf16 %v2109_v16, %v2108_v14 }
0x113b   :  { %v1441_v20 = vpop.permute.xlu0 %1440 }
0x113c   :  { %v1443_v10 = vmul.f32 %v3055_v9, %v1441_v20  ;;  %v2111_v20 = vld [vmem:[#allocation7 + $0x18] sm:$0xff] }
0x113e   :  { %1545 = vrot.lane.b32.xlu1 %v1443_v10, %s3197_s2 }
0x118b   :  { %v1515_v21 = vpop.f32.mrb[24].mxu0 }
0x118c   :  { %v1519_v22 = vadd.f32 %v1515_v21, %v3447_v11  ;;  %v2740_v24 = vpop.f32.mrb[25].mxu0 }
0x118e   :  { %3058 = vtanh.f32 %v1519_v22  ;;  %v2476_v11 = vmul.f32 -1.442695, %v1519_v22 }
0x1190   :  { %3060 = vpow2.f32 %v2476_v11 }
0x1198   :  { %v3059_v25 = vpop.eup %3058 }
0x1199   :  { %1529 = vrot.lane.b32.xlu0 %v3059_v25, %s3196_s0  ;;  %v2112_v25 = vld [vmem:[#allocation7 + $0x20] sm:$0xff] }
0x119a   :  { %v3061_v26 = vpop.eup %3060 }
0x119b   :  { %v1523_v28 = vadd.f32 1.0, %v3061_v26 }
0x119d   :  { %3062 = vrcp.f32 %v1523_v28  ;;  %v3652_v28 = vld [vmem:[%s3711_s9] sm:$0xff]  ;;  %s3198_s9 = smov [#allocation8]  }
0x119e   :  { %s2435_s4 = sshll.u32 %s3198_s9, 4  ;;  %s2436_s4 = int_to_ptr.vmem [resolvable:$true] %s2435_s4 }
0x119f   :  { %s3160_s16 = scalar_lea.vmem %s2436_s4, 128  ;;  %p3165_p11 = scmp.lt.s32.totalorder %s2436_s4, %s2436_s4 }
0x11a0   :  { %p3161_p10 = scmp.ne.s32.totalorder %s2436_s4, %s3160_s16  ;;  %p3166_p12 = scmp.lt.s32.totalorder %s3160_s16, %s3160_s16 }
0x11a2   :  { %p3167_p13 = por %p3166_p12, %p3165_p11 }
0x11a4   :  { %p3168_p0 = pnand %p3167_p13, %p3161_p10 }
0x11a7   :  { %v3063_v29 = vpop.eup %3062 }
0x11b0   :  { %v1546_v19 = vpop.permute.xlu1 %1545 }
0x11b1   :  { %2750 = vmatmul.mubr.msk.f32.vlgmr.msra.gmra.mrb[16].mxu1 %vm105_vm1, %v1546_v19  ;;  %v2113_v19 = vld [vmem:[#allocation7 + $0x28] sm:$0xff] }
0x11b2   :  { %2929 = vmatpush3.bf16.msra.mxu1 %v3356_v23  ;;  %2771 = vmatprep.mubr.msk.f32.mxu1 %vm3195_vm0, %v3194_v1  ;;  %v1527_v23 = vmul.f32 %v3063_v29, %v1337_v55 }
0x11b3   :  { %2930 = vmatprep.subr.bf16.mxu1 %v3193_v0 }
0x11b6   :  { %2932 = vmatpush3.bf16.msra.mxu1 %v3367_v27 }
0x11b7   :  { %2785 = vmatprep.subr.mxu1 %v3194_v1 }
0x120b   :  { %v1530_v59 = vpop.permute.xlu0 %1529 }
0x120c   :  { %v1532_v13 = vmul.f32 %v3063_v29, %v1530_v59 }
0x120e   :  { %1534 = vrot.lane.b32.xlu1 %v1532_v13, %s3197_s2 }
0x1280   :  { %v1535_v30 = vpop.permute.xlu1 %1534 }
0x1281   :  { %v3600_v31 = vadd.f32 %v1535_v30, %v1527_v23 }
0x1283   :  { %3064 = vtanh.f32 %v3600_v31 }
0x1284   :  { %v1615_v32 = vpop.f32.mrb[16].mxu1 }
0x1285   :  { %v1619_v27 = vadd.f32 %v1615_v32, %v3428_v51  ;;  %v2751_v61 = vpop.f32.mrb[17].mxu1  ;;  %v2114_v32 = vld [vmem:[#allocation7 + $0x30] sm:$0xff] }
0x1287   :  { %3066 = vtanh.f32 %v1619_v27  ;;  %v2478_v35 = vmul.f32 -1.442695, %v1619_v27  ;;  %v2115_v27 = vld [vmem:[#allocation7 + $0x38] sm:$0xff] }
0x1288   :  { %v2949_v61 = vpack.c.bf16 %v2115_v27, %v2114_v32 }
0x1289   :  { %3068 = vpow2.f32 %v2478_v35 }
0x128d   :  { %v3065_v33 = vpop.eup %3064 }
0x128e   :  { %1540 = vrot.lane.b32.xlu0 %v3065_v33, %s3196_s0 }
0x1291   :  { %v3067_v34 = vpop.eup %3066 }
0x1292   :  { %1629 = vrot.lane.b32.xlu0 %v3067_v34, %s3196_s0 }
0x1293   :  { %v3069_v37 = vpop.eup %3068 }
0x1294   :  { %v1623_v38 = vadd.f32 1.0, %v3069_v37 }
0x1296   :  { %3070 = vrcp.f32 %v1623_v38 }
0x12a0   :  { %v3071_v41 = vpop.eup %3070 }
0x12a1   :  { %v1627_v50 = vmul.f32 %v3071_v41, %v3583_v17  ;;  %v2110_v17 = vld [vmem:[#allocation7 + $0x10] sm:$0xff] }
0x12a2   :  { %v2943_v21 = vpack.c.bf16 %v2111_v20, %v2110_v17 }
0x1300   :  { %v1541_v39 = vpop.permute.xlu0 %1540 }
0x1301   :  { %v1543_v40 = vmul.f32 %v3063_v29, %v1541_v39 }
0x1303   :  { %1645 = vrot.lane.b32.xlu1 %v1543_v40, %s3197_s2 }
0x1304   :  { %v1630_v42 = vpop.permute.xlu0 %1629 }
0x1305   :  { %v1632_v51 = vmul.f32 %v3071_v41, %v1630_v42 }
0x1307   :  { %1634 = vrot.lane.b32.xlu1 %v1632_v51, %s3197_s2 }
0x1375   :  { %v1646_v47 = vpop.permute.xlu1 %1645 }
0x1376   :  { %2761 = vmatmul.mubr.msk.f32.vlgmr.msra.gmra.mrb[26].mxu0 %vm105_vm1, %v1646_v47 }
0x1377   :  { %2935 = vmatpush3.bf16.msra.mxu0 %v2934_v44  ;;  %2782 = vmatprep.mubr.msk.f32.mxu0 %vm3195_vm0, %v3194_v1 }
0x1378   :  { %2936 = vmatprep.subr.bf16.mxu0 %v3193_v0 }
0x1379   :  { %v1635_v4 = vpop.permute.xlu1 %1634 }
0x137a   :  { %v3613_v52 = vadd.f32 %v1635_v4, %v1627_v50 }
0x137b   :  { %2938 = vmatpush3.bf16.msra.mxu0 %v2937_v48 }
0x137c   :  { %3072 = vtanh.f32 %v3613_v52  ;;  %2939 = vmatprep.subr.bf16.mxu0 %v3193_v0 }
0x137e   :  { %2783 = vmatmul.mubr.msk.f32.vlgmr.msra.gmra.mrb[28].mxu0 %vm105_vm1, %v1855_v53 }
0x137f   :  { %2811 = vmatprep.mubr.msk.f32.mxu0 %vm3195_vm0, %v3194_v1  ;;  %2941 = vmatpush3.bf16.msra.mxu0 %v2940_v18 }
0x1380   :  { %2942 = vmatprep.subr.bf16.mxu0 %v3193_v0 }
0x1383   :  { %2944 = vmatpush3.bf16.msra.mxu0 %v2943_v21 }
0x1384   :  { %2945 = vmatprep.subr.bf16.mxu0 %v3193_v0 }
0x1386   :  { %v3073_v55 = vpop.eup %3072 }
0x1387   :  { %1640 = vrot.lane.b32.xlu0 %v3073_v55, %s3196_s0 }
0x138b   :  { %1944 = vrot.lane.b32.xlu0 %v3627_v56, %s3196_s0 }
0x13f9   :  { %v1641_v58 = vpop.permute.xlu0 %1640 }
0x13fa   :  { %v1643_v49 = vmul.f32 %v3071_v41, %v1641_v58 }
0x13fc   :  { %1745 = vrot.lane.b32.xlu1 %v1643_v49, %s3197_s2 }
0x13fd   :  { %v1945_v12 = vpop.permute.xlu0 %1944 }
0x1449   :  { %v1715_v60 = vpop.f32.mrb[26].mxu0 }
0x144a   :  { %v3633_v62 = vadd.f32 %v1715_v60, %v3451_v15  ;;  %v2762_v63 = vpop.f32.mrb[27].mxu0 }
0x144c   :  { %v2480_v45 = vmul.f32 -1.442695, %v3633_v62 }
0x1451   :  { %v1929_v3 = vpop.f32.mrb[28].mxu0 }
0x1452   :  { %v2784_v5 = vpop.f32.mrb[29].mxu0  ;;  %v1939_v7 = vmul.f32 %v3627_v56, %v1929_v3 }
0x1454   :  { %v1941_v2 = vsel %vm1940_vm2, %v1939_v7, 0.0 }
0x1455   :  { %1942 = vadd.xlane.f32.xlu1 %v1941_v2 }
0x146e   :  { %v1746_v9 = vpop.permute.xlu1 %1745 }
0x146f   :  { %2772 = vmatmul.mubr.msk.f32.vlgmr.msra.gmra.mrb[18].mxu1 %vm105_vm1, %v1746_v9 }
0x1470   :  { %2786 = vmatpush3.xpose.msk.msra.mxu1 %vm1940_vm2, %v1929_v3  ;;  %2787 = vmatprep.mubr.msk.f32.mxu1 %vm3195_vm0, %v3194_v1 }
0x1471   :  { %2790 = vmatprep.subr.mxu1 %v3194_v1 }
0x1473   :  { %2788 = vmatmul.mubr.msk.f32.vlgmr.msra.gmra.mrb[20].mxu1 %vm1940_vm2, %v1945_v12 }
0x1474   :  { %2791 = vmatpush3.msra.mxu1 %v1929_v3  ;;  %2792 = vmatprep.mubr.msk.f32.mxu1 %vm3195_vm0, %v3194_v1 }
0x1475   :  { %2814 = vmatprep.subr.mxu1 %v3194_v1 }
0x14e2   :  { %v1943_v11 = vpop.xlane.xlu1 %1942 }
0x1542   :  { %v1815_v15 = vpop.f32.mrb[18].mxu1 }
0x1543   :  { %v1819_v57 = vadd.f32 %v1815_v15, %v3424_v46  ;;  %v2773_v8 = vpop.f32.mrb[19].mxu1  ;;  %v2946_v46 = vpack.c.bf16 %v2113_v19, %v2112_v25 }
0x1545   :  { %3074 = vtanh.f32 %v1819_v57  ;;  %2947 = vmatpush3.bf16.msra.mxu0 %v2946_v46 }
0x1546   :  { %v2017_v10 = vpop.f32.mrb[20].mxu1  ;;  %2948 = vmatprep.subr.bf16.mxu0 %v3193_v0  ;;  %v2482_v0 = vmul.f32 -1.442695, %v1819_v57 }
0x1547   :  { %v2024_v22 = vrot.slane %v2017_v10, %v3418_v36  ;;  %v2789_v24 = vpop.f32.mrb[21].mxu1 }
0x1549   :  { %v2025_v26 = vadd.f32 %v2024_v22, %v1943_v11  ;;  %2950 = vmatpush3.bf16.msra.mxu0 %v2949_v61 }
0x154b   :  { %vm2026_vm3 = vcmp.ge.f32.partialorder %v2025_v26, 0.0  ;;  %v2027_v29 = vmul.f32 0.01, %v2025_v26 }
0x154d   :  { %v2028_v59 = vsel %vm2026_vm3, %v2025_v26, %v2027_v29 }
0x154e   :  { %v2029_v13 = vmul.f32 %v2028_v59, %v3652_v28 }
0x154f   :  { %v3075_v23 = vpop.eup %3074 }
0x1550   :  { %3076 = vtanh.f32 %v2029_v13  ;;  %1829 = vrot.lane.b32.xlu1 %v3075_v23, %s3196_s0 }
0x1551   :  { %3078 = vpow2.f32 %v2482_v0 }
0x1552   :  { %3080 = vtanh.f32 %v3633_v62 }
0x155a   :  { %v3077_v30 = vpop.eup %3076 }
0x155b   :  { %2793 = vmatmul.mubr.msk.f32.vlgmr.msra.gmra.mrb[22].mxu1 %vm2031_vm4, %v3077_v30  ;;  %v3079_v42 = vpop.eup %3078 }
0x155c   :  { %2816 = vmatprep.mubr.msk.f32.mxu1 %vm3195_vm0, %v3194_v1  ;;  %v1823_v51 = vadd.f32 1.0, %v3079_v42  ;;  %v3081_v54 = vpop.eup %3080 }
0x155e   :  { %3082 = vrcp.f32 %v1823_v51 }
0x155f   :  { %3084 = vpow2.f32 %v2480_v45 }
0x1568   :  { %v3083_v44 = vpop.eup %3082 }
0x1569   :  { %v3085_v47 = vpop.eup %3084 }
0x156a   :  { %v1723_v48 = vadd.f32 1.0, %v3085_v47 }
0x156c   :  { %3086 = vrcp.f32 %v1723_v48 }
0x1576   :  { %v3087_v4 = vpop.eup %3086 }
0x15c2   :  { %v1830_v43 = vpop.permute.xlu1 %1829 }
0x15c3   :  { %v1832_v6 = vmul.f32 %v3083_v44, %v1830_v43 }
0x162e   :  { %v2101_v33 = vpop.f32.mrb[22].mxu1 }
0x162f   :  { %vm2105_vm5 = vcmp.ge.f32.partialorder %v2101_v33, 0.0  ;;  %v2106_v34 = vmul.f32 0.01, %v2101_v33  ;;  %v2794_v35 = vpop.f32.mrb[23].mxu1 }
0x1631   :  { %v2107_v37 = vsel %vm2105_vm5, %v2101_v33, %v2106_v34 }
0x1632   :  { %2812 = vmatmul.mubr.msk.f32.vlgmr.msra.gmra.mrb[30].mxu0 %vm1940_vm2, %v2107_v37 }
0x1705   :  { %v2185_v38 = vpop.f32.mrb[30].mxu0 }
0x1706   :  { %v2813_v39 = vpop.f32.mrb[31].mxu0  ;;  %2815 = vmatpush3.xpose.msk.msra.mxu1 %vm1940_vm2, %v2185_v38  ;;  %v2189_v40 = vmul.f32 %v3627_v56, %v2185_v38  ;;  %v1827_v56 = vmul.f32 %v3083_v44, %v3613_v52  ;;  %v1727_v52 = vmul.f32 %v3087_v4, %v3600_v31 }
0x1707   :  { %2819 = vmatprep.subr.mxu1 %v3194_v1 }
0x1708   :  { %v2190_v41 = vsel %vm1940_vm2, %v2189_v40, 0.0 }
0x1709   :  { %2817 = vmatmul.mubr.msk.f32.vlgmr.msra.gmra.mrb[24].mxu1 %vm1940_vm2, %v1945_v12  ;;  %2191 = vadd.xlane.f32.xlu0 %v2190_v41 }
0x170a   :  { %2820 = vmatpush3.msra.mxu1 %v2185_v38  ;;  %2821 = vmatprep.mubr.msk.f32.mxu1 %vm3195_vm0, %v3194_v1 }
0x170b   :  { %2824 = vmatprep.subr.mxu1 %v3194_v1 }
0x171f   :  { %1729 = vrot.lane.b32.xlu0 %v3081_v54, %s3196_s0 }
0x1723   :  { %1834 = vrot.lane.b32.xlu0 %v1832_v6, %s3197_s2 }
0x1796   :  { %v2192_v50 = vpop.xlane.xlu0 %2191 }
0x179a   :  { %v1730_v53 = vpop.permute.xlu0 %1729 }
0x179b   :  { %v1732_v55 = vmul.f32 %v3087_v4, %v1730_v53 }
0x179d   :  { %1734 = vrot.lane.b32.xlu1 %v1732_v55, %s3197_s2 }
0x179e   :  { %v1835_v58 = vpop.permute.xlu0 %1834 }
0x179f   :  { %v1837_v49 = vadd.f32 %v1835_v58, %v1827_v56 }
0x17a1   :  { %3088 = vtanh.f32 %v1837_v49 }
0x17ab   :  { %v3089_v60 = vpop.eup %3088 }
0x17ac   :  { %1840 = vrot.lane.b32.xlu0 %v3089_v60, %s3196_s0 }
0x17dc   :  { %v2262_v63 = vpop.f32.mrb[24].mxu1 }
0x17dd   :  { %v2269_v62 = vrot.slane %v2262_v63, %v3418_v36  ;;  %v2818_v3 = vpop.f32.mrb[25].mxu1 }
0x17df   :  { %v2270_v5 = vadd.f32 %v2269_v62, %v2192_v50 }
0x17e1   :  { %vm2271_vm6 = vcmp.ge.f32.partialorder %v2270_v5, 0.0  ;;  %v2272_v7 = vmul.f32 0.01, %v2270_v5 }
0x17e3   :  { %v2273_v2 = vsel %vm2271_vm6, %v2270_v5, %v2272_v7 }
0x17e4   :  { %v2274_v9 = vmul.f32 %v2273_v2, %v3652_v28 }
0x17e6   :  { %3090 = vtanh.f32 %v2274_v9 }
0x17f0   :  { %v3091_v12 = vpop.eup %3090 }
0x17f1   :  { %2822 = vmatmul.mubr.msk.f32.vlgmr.msra.gmra.mrb[26].mxu1 %vm2031_vm4, %v3091_v12 }
0x17f2   :  { %2826 = vmatprep.mubr.msk.f32.mxu1 %vm3195_vm0, %v3194_v1 }
0x180f   :  { %v1735_v15 = vpop.permute.xlu1 %1734 }
0x1810   :  { %v1737_v57 = vadd.f32 %v1735_v15, %v1727_v52 }
0x1812   :  { %3092 = vtanh.f32 %v1737_v57 }
0x181c   :  { %v3093_v36 = vpop.eup %3092 }
0x181d   :  { %1740 = vrot.lane.b32.xlu1 %v3093_v36, %s3196_s0 }
0x181e   :  { %v1841_v8 = vpop.permute.xlu0 %1840 }
0x181f   :  { %v1843_v14 = vmul.f32 %v3083_v44, %v1841_v8 }
0x1821   :  { %1849 = vrot.lane.b32.xlu0 %v1843_v14, %s3196_s0 }
0x188f   :  { %v1741_v16 = vpop.permute.xlu1 %1740 }
0x1890   :  { %v1743_v17 = vmul.f32 %v3087_v4, %v1741_v16 }
0x1892   :  { %1845 = vrot.lane.b32.xlu1 %v1743_v17, %s3197_s2 }
0x1893   :  { %v1850_v31 = vpop.permute.xlu0 %1849 }
0x18c4   :  { %v2345_v18 = vpop.f32.mrb[26].mxu1 }
0x18c5   :  { %vm2349_vm7 = vcmp.ge.f32.partialorder %v2345_v18, 0.0  ;;  %v2350_v20 = vmul.f32 0.01, %v2345_v18  ;;  %v2823_v1 = vpop.f32.mrb[27].mxu1 }
0x18c7   :  { %v2351_v10 = vsel %vm2349_vm7, %v2345_v18, %v2350_v20 }
0x18c8   :  { %2825 = vmatpush3.xpose.msk.msra.mxu1 %vm1940_vm2, %v2351_v10 }
0x1904   :  { %v1846_v21 = vpop.permute.xlu1 %1845 }
0x1905   :  { %v1852_v22 = vsel %vm105_vm1, %v1846_v21, %v1850_v31 }
0x1906   :  { %2827 = vmatmul.mubr.msk.f32.vlgmr.msra.gmra.mrb[28].mxu1 %vm1940_vm2, %v1852_v22 }
0x19d9   :  { %v2424_v24 = vpop.f32.mrb[28].mxu1 }
0x19da   :  { %2428 = vst.msk [vmem:[#allocation8] sm:$0xff] %vm2031_vm4, %v2424_v24  ;;  %v2828_v25 = vpop.f32.mrb[29].mxu1 }
0x19db   :  { %3171 = shalt.err (!%p3168_p0)
}
0x19dc   :  { %s3172_s12 = scalar_lea.hbm %s3712_s10, 128 }
0x19dd   :  { %p3173_p1 = scmp.ne.s32.totalorder %s3712_s10, %s3172_s12  ;;  %p3176_p2 = scmp.lt.u32.totalorder %s3172_s12, %s3712_s10 }
0x19df   :  { %p3178_p3 = pnand %p3176_p2, %p3173_p1 }
0x19e1   :  { %3181 = shalt.err (!%p3178_p3)
}
0x19e2   :  { %2438 = dma.vmem_to_hbm [thread:$0]  %s2436_s4, 128, %s3712_s10, [#allocation4]  }
0x19e3   :  { %3186 = dma.done.wait [#allocation4], 128  }
0x19e4   :  { %3187 = vsyncadd [#allocation4], 4294967168 }
0x19e5   :  { %2442 = vsyncpa [#allocation3], 1 }
0x19e6   :  { %2443 = vsyncpa [#allocation6], 1 }
0x19e7   :  { %2444 = vsyncpa [#allocation4], 1 }

</bundles_post_ra>
